<compile_context>
chip_gen: v7x
topology: tpu7x:2x2x1
jax: 0.10.0
libtpu: 0.0.40
codegen_flags: <defaults>
</compile_context>

<pallas_src>
import functools

import jax
import jax.numpy as jnp
from jax.experimental import pallas as pl
from jax.experimental.pallas import tpu as pltpu


def _round_up(x, m):
    return ((x + m - 1) // m) * m


def _qfunc_kernel(obs_ref, act_ref, w1o_ref, w1a_ref, b1_ref,
                  w2_ref, b2_ref, w3_ref, b3_ref, o_ref):
    # Layer 1: two MXU pushes into one f32 accumulator replaces concat([obs, act]).
    h1 = jnp.dot(obs_ref[...], w1o_ref[...], preferred_element_type=jnp.float32)
    h1 = h1 + jnp.dot(act_ref[...], w1a_ref[...], preferred_element_type=jnp.float32)
    h1 = jnp.maximum(h1 + b1_ref[...], 0.0)                       # (TB, H1)
    # Layer 2: natural K = hidden size (no 128 padding).
    h2 = jnp.dot(h1, w2_ref[...], preferred_element_type=jnp.float32)
    h2 = jnp.maximum(h2 + b2_ref[...], 0.0)                       # (TB, H2)
    # Output layer (single column): VPU multiply + XLU lane reduction instead
    # of a third MXU matmul/drain.
    q = jnp.sum(h2 * w3_ref[...], axis=-1, keepdims=True) + b3_ref[...]
    o_ref[...] = q                                                # (TB, 1)


def prepare_params(params, observation_dim, action_dim):
    """One-time parameter preparation (done at init, NOT per forward call).

    Splits W1 into obs/act halves (so the kernel never needs a concatenated
    input), pads the contraction (K) dims to sublane multiples of 8, and
    reshapes biases / the final weight column into kernel-friendly rows.
    """
    w1 = params["W1"].astype(jnp.float32)                 # (obs+act, H1)
    h1 = w1.shape[1]
    ko = _round_up(observation_dim, 8)
    ka = _round_up(action_dim, 8)
    w1_obs = jnp.pad(w1[:observation_dim], ((0, ko - observation_dim), (0, 0)))
    w1_act = jnp.pad(w1[observation_dim:], ((0, ka - action_dim), (0, 0)))
    w2 = params["W2"].astype(jnp.float32)                 # (H1, H2)
    h2 = w2.shape[1]
    return {
        "W1_obs": w1_obs,                                 # (ko, H1)
        "W1_act": w1_act,                                 # (ka, H1)
        "b1": params["b1"].astype(jnp.float32).reshape(1, h1),
        "W2": w2,                                         # (H1, H2)
        "b2": params["b2"].astype(jnp.float32).reshape(1, h2),
        "w3_row": params["W3"].astype(jnp.float32).T,     # (1, H2)
        "b3": params["b3"].astype(jnp.float32).reshape(1, 1),
    }


def continuous_mlp_q_function(obs, act, prepared, block_b=512):
    """Compute Q(s, a) with the Pallas kernel.

    obs: (B, obs_dim) f32,  act: (B, act_dim) f32.
    prepared: output of prepare_params (weights already split/padded/reshaped).
    Returns (B, 1) f32.
    """
    B = obs.shape[0]
    ko = prepared["W1_obs"].shape[0]
    ka = prepared["W1_act"].shape[0]

    # Pad batch to a fixed bucket (multiple of block_b) so varying B does not
    # force a new compile for every distinct batch size. Feature dims are only
    # padded if the raw dims were not already multiples of 8 (no-op here).
    BP = _round_up(max(B, 1), block_b)
    obs_p = jnp.pad(obs.astype(jnp.float32),
                    ((0, BP - B), (0, ko - obs.shape[1])))
    act_p = jnp.pad(act.astype(jnp.float32),
                    ((0, BP - B), (0, ka - act.shape[1])))

    grid = (BP // block_b,)

    def batch_spec(width):
        return pl.BlockSpec((block_b, width), lambda i: (i, 0))

    def resident(a):  # full-array block, constant index -> stays VMEM-resident
        return pl.BlockSpec(a.shape, lambda i: (0, 0))

    out = pl.pallas_call(
        _qfunc_kernel,
        out_shape=jax.ShapeDtypeStruct((BP, 1), jnp.float32),
        grid=grid,
        in_specs=[
            batch_spec(ko),
            batch_spec(ka),
            resident(prepared["W1_obs"]),
            resident(prepared["W1_act"]),
            resident(prepared["b1"]),
            resident(prepared["W2"]),
            resident(prepared["b2"]),
            resident(prepared["w3_row"]),
            resident(prepared["b3"]),
        ],
        out_specs=pl.BlockSpec((block_b, 1), lambda i: (i, 0)),
        compiler_params=pltpu.CompilerParams(
            dimension_semantics=("parallel",),   # shard batch across TCs (v7x)
        ),
    )(obs_p, act_p,
      prepared["W1_obs"], prepared["W1_act"], prepared["b1"],
      prepared["W2"], prepared["b2"], prepared["w3_row"], prepared["b3"])

    return out[:B]


def init_params(key, observation_dim, action_dim, hidden_sizes=(32, 32)):
    """Deterministic init matching nn.init.uniform(param, -0.003, 0.003)."""
    sizes = [observation_dim + action_dim] + list(hidden_sizes) + [1]
    params = {}
    keys = jax.random.split(key, 2 * (len(sizes) - 1))
    for i in range(len(sizes) - 1):
        fan_in, fan_out = sizes[i], sizes[i + 1]
        params[f"W{i+1}"] = jax.random.uniform(
            keys[2 * i], (fan_in, fan_out), jnp.float32, -0.003, 0.003)
        params[f"b{i+1}"] = jax.random.uniform(
            keys[2 * i + 1], (fan_out,), jnp.float32, -0.003, 0.003)
    return params


def _reference(obs, act, params):
    x = jnp.concatenate([obs, act], axis=1)
    h1 = jnp.maximum(x @ params["W1"] + params["b1"], 0.0)
    h2 = jnp.maximum(h1 @ params["W2"] + params["b2"], 0.0)
    return h2 @ params["W3"] + params["b3"]


if __name__ == "__main__":
    observation_dim = 16
    action_dim = 8
    batch = 4

    key = jax.random.PRNGKey(0)
    k_params, k_obs, k_act = jax.random.split(key, 3)

    params = init_params(k_params, observation_dim, action_dim, hidden_sizes=(32, 32))
    prepared = prepare_params(params, observation_dim, action_dim)

    obs = jax.random.normal(k_obs, (batch, observation_dim), jnp.float32)
    act = jax.random.normal(k_act, (batch, action_dim), jnp.float32)

    q_fn = jax.jit(functools.partial(continuous_mlp_q_function, prepared=prepared))
    q = q_fn(obs, act)
    q = jax.block_until_ready(q)

    q_ref = _reference(obs, act, params)
    assert q.shape == (batch, 1), q.shape
    assert jnp.allclose(q, q_ref, atol=1e-5, rtol=1e-4), (q, q_ref)

    print("KERNEL_OK")
</pallas_src>

<mosaic_0001>
module attributes {stable_mosaic.version = 11 : i64} {
  func.func @_qfunc_kernel(%arg0: i32, %arg1: memref<512x16xf32, #tpu.memory_space<vmem>>, %arg2: memref<512x8xf32, #tpu.memory_space<vmem>>, %arg3: memref<16x32xf32, #tpu.memory_space<vmem>>, %arg4: memref<8x32xf32, #tpu.memory_space<vmem>>, %arg5: memref<1x32xf32, #tpu.memory_space<vmem>>, %arg6: memref<32x32xf32, #tpu.memory_space<vmem>>, %arg7: memref<1x32xf32, #tpu.memory_space<vmem>>, %arg8: memref<1x32xf32, #tpu.memory_space<vmem>>, %arg9: memref<1x1xf32, #tpu.memory_space<vmem>>, %arg10: memref<512x1xf32, #tpu.memory_space<vmem>>) attributes {dimension_semantics = [#tpu.dimension_semantics<parallel>], iteration_bounds = array<i64: 1>, scalar_prefetch = 0 : i64, scratch_operands = 0 : i64, tpu.core_type = #tpu.core_type<tc>, window_params = [{transform_indices = @transform_0, window_bounds = array<i64: 512, 16>}, {transform_indices = @transform_1, window_bounds = array<i64: 512, 8>}, {pipeline_mode = #tpu.pipeline_mode<synchronous>, transform_indices = @transform_2, window_bounds = array<i64: 16, 32>}, {pipeline_mode = #tpu.pipeline_mode<synchronous>, transform_indices = @transform_3, window_bounds = array<i64: 8, 32>}, {pipeline_mode = #tpu.pipeline_mode<synchronous>, transform_indices = @transform_4, window_bounds = array<i64: 1, 32>}, {pipeline_mode = #tpu.pipeline_mode<synchronous>, transform_indices = @transform_5, window_bounds = array<i64: 32, 32>}, {pipeline_mode = #tpu.pipeline_mode<synchronous>, transform_indices = @transform_6, window_bounds = array<i64: 1, 32>}, {pipeline_mode = #tpu.pipeline_mode<synchronous>, transform_indices = @transform_7, window_bounds = array<i64: 1, 32>}, {pipeline_mode = #tpu.pipeline_mode<synchronous>, transform_indices = @transform_8, window_bounds = array<i64: 1, 1>}, {transform_indices = @transform_9, window_bounds = array<i64: 512, 1>}]} {
    %c0 = arith.constant 0 : index
    %c0_0 = arith.constant 0 : index
    %0 = vector.load %arg1[%c0, %c0_0] : memref<512x16xf32, #tpu.memory_space<vmem>>, vector<512x16xf32>
    %c0_1 = arith.constant 0 : index
    %c0_2 = arith.constant 0 : index
    %1 = vector.load %arg3[%c0_1, %c0_2] : memref<16x32xf32, #tpu.memory_space<vmem>>, vector<16x32xf32>
    %cst = arith.constant dense<0.000000e+00> : vector<512x32xf32>
    %2 = tpu.matmul %0, %1, %cst {dimension_numbers = #tpu.dot_dimension_numbers<[1], [0], [0], [1], [0, 0, 1, 1], [], []>} : vector<512x16xf32>, vector<16x32xf32>, vector<512x32xf32> -> vector<512x32xf32>
    %c0_3 = arith.constant 0 : index
    %c0_4 = arith.constant 0 : index
    %3 = vector.load %arg2[%c0_3, %c0_4] : memref<512x8xf32, #tpu.memory_space<vmem>>, vector<512x8xf32>
    %c0_5 = arith.constant 0 : index
    %c0_6 = arith.constant 0 : index
    %4 = vector.load %arg4[%c0_5, %c0_6] : memref<8x32xf32, #tpu.memory_space<vmem>>, vector<8x32xf32>
    %cst_7 = arith.constant dense<0.000000e+00> : vector<512x32xf32>
    %5 = tpu.matmul %3, %4, %cst_7 {dimension_numbers = #tpu.dot_dimension_numbers<[1], [0], [0], [1], [0, 0, 1, 1], [], []>} : vector<512x8xf32>, vector<8x32xf32>, vector<512x32xf32> -> vector<512x32xf32>
    %6 = arith.addf %2, %5 : vector<512x32xf32>
    %c0_8 = arith.constant 0 : index
    %c0_9 = arith.constant 0 : index
    %7 = vector.load %arg5[%c0_8, %c0_9] : memref<1x32xf32, #tpu.memory_space<vmem>>, vector<1x32xf32>
    %8 = vector.broadcast %7 : vector<1x32xf32> to vector<512x32xf32>
    %9 = arith.addf %6, %8 : vector<512x32xf32>
    %cst_10 = arith.constant 0.000000e+00 : f32
    %10 = vector.broadcast %cst_10 : f32 to vector<512x32xf32>
    %11 = arith.maximumf %9, %10 : vector<512x32xf32>
    %c0_11 = arith.constant 0 : index
    %c0_12 = arith.constant 0 : index
    %12 = vector.load %arg6[%c0_11, %c0_12] : memref<32x32xf32, #tpu.memory_space<vmem>>, vector<32x32xf32>
    %cst_13 = arith.constant dense<0.000000e+00> : vector<512x32xf32>
    %13 = tpu.matmul %11, %12, %cst_13 {dimension_numbers = #tpu.dot_dimension_numbers<[1], [0], [0], [1], [0, 0, 1, 1], [], []>} : vector<512x32xf32>, vector<32x32xf32>, vector<512x32xf32> -> vector<512x32xf32>
    %c0_14 = arith.constant 0 : index
    %c0_15 = arith.constant 0 : index
    %14 = vector.load %arg7[%c0_14, %c0_15] : memref<1x32xf32, #tpu.memory_space<vmem>>, vector<1x32xf32>
    %15 = vector.broadcast %14 : vector<1x32xf32> to vector<512x32xf32>
    %16 = arith.addf %13, %15 : vector<512x32xf32>
    %cst_16 = arith.constant 0.000000e+00 : f32
    %17 = vector.broadcast %cst_16 : f32 to vector<512x32xf32>
    %18 = arith.maximumf %16, %17 : vector<512x32xf32>
    %c0_17 = arith.constant 0 : index
    %c0_18 = arith.constant 0 : index
    %19 = vector.load %arg8[%c0_17, %c0_18] : memref<1x32xf32, #tpu.memory_space<vmem>>, vector<1x32xf32>
    %20 = vector.broadcast %19 : vector<1x32xf32> to vector<512x32xf32>
    %21 = arith.mulf %18, %20 : vector<512x32xf32>
    %cst_19 = arith.constant dense<0.000000e+00> : vector<512xf32>
    %22 = vector.multi_reduction <add>, %21, %cst_19 [1] : vector<512x32xf32> to vector<512xf32>
    %23 = vector.shape_cast %22 : vector<512xf32> to vector<512x1xf32>
    %c0_20 = arith.constant 0 : index
    %c0_21 = arith.constant 0 : index
    %24 = vector.load %arg9[%c0_20, %c0_21] : memref<1x1xf32, #tpu.memory_space<vmem>>, vector<1x1xf32>
    %25 = vector.broadcast %24 : vector<1x1xf32> to vector<512x1xf32>
    %26 = arith.addf %23, %25 : vector<512x1xf32>
    %c0_22 = arith.constant 0 : index
    %c0_23 = arith.constant 0 : index
    %27 = vector.load %arg10[%c0_22, %c0_23] : memref<512x1xf32, #tpu.memory_space<vmem>>, vector<512x1xf32>
    tpu.vector_store %arg10[%c0_22, %c0_23], %26 {strides = array<i32>} : memref<512x1xf32, #tpu.memory_space<vmem>>, vector<512x1xf32>,
    return
  }
  func.func @transform_0(%arg0: i32) -> (i32, i32) {
    %c0_i32 = arith.constant 0 : i32
    %c0_i32_0 = arith.constant 0 : i32
    return %arg0, %c0_i32 : i32, i32
  }
  func.func @transform_1(%arg0: i32) -> (i32, i32) {
    %c0_i32 = arith.constant 0 : i32
    %c0_i32_0 = arith.constant 0 : i32
    return %arg0, %c0_i32 : i32, i32
  }
  func.func @transform_2(%arg0: i32) -> (i32, i32) {
    %c0_i32 = arith.constant 0 : i32
    %c0_i32_0 = arith.constant 0 : i32
    %c0_i32_1 = arith.constant 0 : i32
    return %c0_i32, %c0_i32_0 : i32, i32
  }
  func.func @transform_3(%arg0: i32) -> (i32, i32) {
    %c0_i32 = arith.constant 0 : i32
    %c0_i32_0 = arith.constant 0 : i32
    %c0_i32_1 = arith.constant 0 : i32
    return %c0_i32, %c0_i32_0 : i32, i32
  }
  func.func @transform_4(%arg0: i32) -> (i32, i32) {
    %c0_i32 = arith.constant 0 : i32
    %c0_i32_0 = arith.constant 0 : i32
    %c0_i32_1 = arith.constant 0 : i32
    return %c0_i32, %c0_i32_0 : i32, i32
  }
  func.func @transform_5(%arg0: i32) -> (i32, i32) {
    %c0_i32 = arith.constant 0 : i32
    %c0_i32_0 = arith.constant 0 : i32
    %c0_i32_1 = arith.constant 0 : i32
    return %c0_i32, %c0_i32_0 : i32, i32
  }
  func.func @transform_6(%arg0: i32) -> (i32, i32) {
    %c0_i32 = arith.constant 0 : i32
    %c0_i32_0 = arith.constant 0 : i32
    %c0_i32_1 = arith.constant 0 : i32
    return %c0_i32, %c0_i32_0 : i32, i32
  }
  func.func @transform_7(%arg0: i32) -> (i32, i32) {
    %c0_i32 = arith.constant 0 : i32
    %c0_i32_0 = arith.constant 0 : i32
    %c0_i32_1 = arith.constant 0 : i32
    return %c0_i32, %c0_i32_0 : i32, i32
  }
  func.func @transform_8(%arg0: i32) -> (i32, i32) {
    %c0_i32 = arith.constant 0 : i32
    %c0_i32_0 = arith.constant 0 : i32
    %c0_i32_1 = arith.constant 0 : i32
    return %c0_i32, %c0_i32_0 : i32, i32
  }
  func.func @transform_9(%arg0: i32) -> (i32, i32) {
    %c0_i32 = arith.constant 0 : i32
    %c0_i32_0 = arith.constant 0 : i32
    return %arg0, %c0_i32 : i32, i32
  }
}

</mosaic_0001>

<bundles_post_ra>
// kernel: continuous_mlp_q_function.1
= control target key start
LH: loop header
LB: loop body
LE: loop exit
PB: predicated region body
PF: predicated region fallthrough
CT: control target
= control target key end

     0   :  { %vm165_vm0 = vcmask 64512   ;;  %vm743_vm1 = vcmask 130048   ;;  %vm1467_vm2 = vcmask 261120   ;;  %vm2443_vm3 = vcmask 7168   ;;  %s4626_s3 = inlined_call_operand.vmem [shape: f32[8,32], index: 3, kind: input, shape index: {}]   ;;  %s4627_s1 = inlined_call_operand.vmem [shape: f32[512,8], index: 1, kind: input, shape index: {}]   ;;  %s4628_s2 = inlined_call_operand.vmem [shape: f32[16,32], index: 2, kind: input, shape index: {}]   ;;  %s4629_s0 = inlined_call_operand.vmem [shape: f32[512,16], index: 0, kind: input, shape index: {}]   ;;  %s4630_s5 = inlined_call_operand.vmem [shape: f32[32,32], index: 5, kind: input, shape index: {}]   ;;  %s4631_s4 = inlined_call_operand.vmem [shape: f32[1,32], index: 4, kind: input, shape index: {}]   ;;  %s4632_s6 = inlined_call_operand.vmem [shape: f32[1,32], index: 6, kind: input, shape index: {}]   ;;  %s4633_s7 = inlined_call_operand.vmem [shape: f32[1,32], index: 7, kind: input, shape index: {}]   ;;  %s4634_s8 = inlined_call_operand.<no memory space> [shape: f32[1,1], index: 8, kind: input, shape index: {}]   ;;  %s4635_s9 = inlined_call_operand.vmem [shape: f32[512,1], index: 9, kind: output, shape index: {}]  }
   0x1   :  { %v164_v0 = vld [vmem:[%s4626_s3] sm:$0xff]  ;;  %v101_v2 = vld [vmem:[%s4627_s1 + $0x8] sm:$0xff]  ;;  %v102_v5 = vld [vmem:[%s4627_s1 + $0x10] sm:$0xff] }
   0x2   :  { %v100_v1 = vld [vmem:[%s4627_s1] sm:$0xff]  ;;  %2907 = vmatprep.subr.mxu0 %v164_v0  ;;  %v99_v4 = vld [vmem:[%s4628_s2 + $0x8] sm:$0xff]  ;;  %3221 = vmatprep.subr.mxu1 %v164_v0  ;;  %v103_v7 = vld [vmem:[%s4627_s1 + $0x18] sm:$0xff] }
   0x3   :  { %2909 = vmatprep.mubr.msk.f32.mxu0 %vm165_vm0, %v100_v1  ;;  %v98_v3 = vld [vmem:[%s4628_s2] sm:$0xff]  ;;  %2908 = vmatpush3.msra.mxu0 %v164_v0  ;;  %v105_v9 = vld [vmem:[%s4627_s1 + $0x28] sm:$0xff]  ;;  %v106_v10 = vld [vmem:[%s4627_s1 + $0x30] sm:$0xff] }
   0x4   :  { %v3209_v6 = vpack.c.bf16 %v99_v4, %v98_v3  ;;  %2910 = vmatmul.mubr.msk.f32.vlgmr.msra.gmra.mrb[0].mxu0 %vm165_vm0, %v101_v2  ;;  %3222 = vmatpush3.msra.mxu1 %v164_v0  ;;  %v104_v8 = vld [vmem:[%s4627_s1 + $0x20] sm:$0xff]  ;;  %v107_v11 = vld [vmem:[%s4627_s1 + $0x38] sm:$0xff]  ;;  %v109_v13 = vld [vmem:[%s4627_s1 + $0x48] sm:$0xff] }
   0x5   :  { %2912 = vmatprep.mubr.msk.f32.mxu0 %vm165_vm0, %v102_v5  ;;  %v108_v12 = vld [vmem:[%s4627_s1 + $0x40] sm:$0xff]  ;;  %v110_v14 = vld [vmem:[%s4627_s1 + $0x50] sm:$0xff]  ;;  %v111_v15 = vld [vmem:[%s4627_s1 + $0x58] sm:$0xff] }
   0x6   :  { %3210 = vmatprep.subr.bf16.mxu0 %v3209_v6  ;;  %v112_v16 = vld [vmem:[%s4627_s1 + $0x60] sm:$0xff]  ;;  %v133_v18 = vld [vmem:[%s4627_s1 + $0x108] sm:$0xff]  ;;  %v134_v19 = vld [vmem:[%s4627_s1 + $0x110] sm:$0xff] }
   0x7   :  { %3212 = vmatpush3.bf16.msra.mxu0 %v3209_v6  ;;  %v132_v17 = vld [vmem:[%s4627_s1 + $0x100] sm:$0xff]  ;;  %v113_v20 = vld [vmem:[%s4627_s1 + $0x68] sm:$0xff]  ;;  %v114_v21 = vld [vmem:[%s4627_s1 + $0x70] sm:$0xff] }
   0x8   :  { %2913 = vmatmul.mubr.msk.f32.gmra.mrb[2].mxu0 %vm165_vm0, %v103_v7  ;;  %2957 = vmatprep.mubr.msk.f32.mxu1 %vm165_vm0, %v132_v17  ;;  %v135_v22 = vld [vmem:[%s4627_s1 + $0x118] sm:$0xff]  ;;  %v136_v23 = vld [vmem:[%s4627_s1 + $0x120] sm:$0xff]  ;;  %v137_v26 = vld [vmem:[%s4627_s1 + $0x128] sm:$0xff] }
   0x9   :  { %2915 = vmatprep.mubr.msk.f32.mxu0 %vm165_vm0, %v104_v8  ;;  %2958 = vmatmul.mubr.msk.f32.vlgmr.msra.gmra.mrb[0].mxu1 %vm165_vm0, %v133_v18  ;;  %v115_v24 = vld [vmem:[%s4627_s1 + $0x78] sm:$0xff]  ;;  %v116_v25 = vld [vmem:[%s4627_s1 + $0x80] sm:$0xff]  ;;  %v138_v27 = vld [vmem:[%s4627_s1 + $0x130] sm:$0xff] }
   0xa   :  { %2960 = vmatprep.mubr.msk.f32.mxu1 %vm165_vm0, %v134_v19  ;;  %v117_v28 = vld [vmem:[%s4627_s1 + $0x88] sm:$0xff]  ;;  %v118_v29 = vld [vmem:[%s4627_s1 + $0x90] sm:$0xff]  ;;  %v139_v30 = vld [vmem:[%s4627_s1 + $0x138] sm:$0xff] }
   0xb   :  { %v140_v31 = vld [vmem:[%s4627_s1 + $0x140] sm:$0xff]  ;;  %v119_v32 = vld [vmem:[%s4627_s1 + $0x98] sm:$0xff]  ;;  %v141_v34 = vld [vmem:[%s4627_s1 + $0x148] sm:$0xff] }
   0xc   :  { %2916 = vmatmul.mubr.msk.f32.gmra.mrb[4].mxu0 %vm165_vm0, %v105_v9  ;;  %v120_v33 = vld [vmem:[%s4627_s1 + $0xa0] sm:$0xff]  ;;  %v142_v35 = vld [vmem:[%s4627_s1 + $0x150] sm:$0xff]  ;;  %v121_v36 = vld [vmem:[%s4627_s1 + $0xa8] sm:$0xff] }
   0xd   :  { %2918 = vmatprep.mubr.msk.f32.mxu0 %vm165_vm0, %v106_v10  ;;  %2961 = vmatmul.mubr.msk.f32.gmra.mrb[2].mxu1 %vm165_vm0, %v135_v22  ;;  %v122_v37 = vld [vmem:[%s4627_s1 + $0xb0] sm:$0xff]  ;;  %v143_v38 = vld [vmem:[%s4627_s1 + $0x158] sm:$0xff]  ;;  %v144_v39 = vld [vmem:[%s4627_s1 + $0x160] sm:$0xff] }
   0xe   :  { %2963 = vmatprep.mubr.msk.f32.mxu1 %vm165_vm0, %v136_v23  ;;  %v123_v40 = vld [vmem:[%s4627_s1 + $0xb8] sm:$0xff]  ;;  %v124_v41 = vld [vmem:[%s4627_s1 + $0xc0] sm:$0xff]  ;;  %v145_v42 = vld [vmem:[%s4627_s1 + $0x168] sm:$0xff] }
   0xf   :  { %v146_v43 = vld [vmem:[%s4627_s1 + $0x170] sm:$0xff]  ;;  %v125_v44 = vld [vmem:[%s4627_s1 + $0xc8] sm:$0xff]  ;;  %v147_v46 = vld [vmem:[%s4627_s1 + $0x178] sm:$0xff] }
  0x10   :  { %2919 = vmatmul.mubr.msk.f32.gmra.mrb[6].mxu0 %vm165_vm0, %v107_v11  ;;  %v126_v45 = vld [vmem:[%s4627_s1 + $0xd0] sm:$0xff]  ;;  %v148_v47 = vld [vmem:[%s4627_s1 + $0x180] sm:$0xff]  ;;  %v127_v48 = vld [vmem:[%s4627_s1 + $0xd8] sm:$0xff] }
  0x11   :  { %2921 = vmatprep.mubr.msk.f32.mxu0 %vm165_vm0, %v108_v12  ;;  %2964 = vmatmul.mubr.msk.f32.gmra.mrb[4].mxu1 %vm165_vm0, %v137_v26  ;;  %v128_v49 = vld [vmem:[%s4627_s1 + $0xe0] sm:$0xff]  ;;  %v149_v50 = vld [vmem:[%s4627_s1 + $0x188] sm:$0xff]  ;;  %v150_v51 = vld [vmem:[%s4627_s1 + $0x190] sm:$0xff] }
  0x12   :  { %2966 = vmatprep.mubr.msk.f32.mxu1 %vm165_vm0, %v138_v27  ;;  %v129_v52 = vld [vmem:[%s4627_s1 + $0xe8] sm:$0xff]  ;;  %v130_v53 = vld [vmem:[%s4627_s1 + $0xf0] sm:$0xff]  ;;  %v151_v54 = vld [vmem:[%s4627_s1 + $0x198] sm:$0xff] }
  0x13   :  { %v152_v55 = vld [vmem:[%s4627_s1 + $0x1a0] sm:$0xff]  ;;  %v131_v56 = vld [vmem:[%s4627_s1 + $0xf8] sm:$0xff]  ;;  %v153_v58 = vld [vmem:[%s4627_s1 + $0x1a8] sm:$0xff] }
  0x14   :  { %2922 = vmatmul.mubr.msk.f32.gmra.mrb[8].mxu0 %vm165_vm0, %v109_v13  ;;  %v34_v57 = vld [vmem:[%s4629_s0] sm:$0xff]  ;;  %v154_v59 = vld [vmem:[%s4627_s1 + $0x1b0] sm:$0xff]  ;;  %v35_v60 = vld [vmem:[%s4629_s0 + $0x8] sm:$0xff] }
  0x15   :  { %2924 = vmatprep.mubr.msk.f32.mxu0 %vm165_vm0, %v110_v14  ;;  %2967 = vmatmul.mubr.msk.f32.gmra.mrb[6].mxu1 %vm165_vm0, %v139_v30  ;;  %v1456_v61 = vld [vmem:[%s4630_s5] sm:$0xff]  ;;  %v1457_v62 = vld [vmem:[%s4630_s5 + $0x8] sm:$0xff]  ;;  %v1458_v63 = vld [vmem:[%s4630_s5 + $0x10] sm:$0xff] }
  0x16   :  { %2969 = vmatprep.mubr.msk.f32.mxu1 %vm165_vm0, %v140_v31  ;;  %v36_v0 = vld [vmem:[%s4629_s0 + $0x10] sm:$0xff]  ;;  %v155_v1 = vld [vmem:[%s4627_s1 + $0x1b8] sm:$0xff]  ;;  %v3213_v2 = vpack.c.bf16 %v1457_v62, %v1456_v61  ;;  %v156_v4 = vld [vmem:[%s4627_s1 + $0x1c0] sm:$0xff] }
  0x17   :  { %v1459_v3 = vld [vmem:[%s4630_s5 + $0x18] sm:$0xff]  ;;  %v38_v7 = vld [vmem:[%s4629_s0 + $0x20] sm:$0xff]  ;;  %v157_v8 = vld [vmem:[%s4627_s1 + $0x1c8] sm:$0xff] }
  0x18   :  { %2925 = vmatmul.mubr.msk.f32.gmra.mrb[10].mxu0 %vm165_vm0, %v111_v15  ;;  %v3217_v5 = vpack.c.bf16 %v1459_v3, %v1458_v63  ;;  %3214 = vmatprep.subr.bf16.mxu1 %v3213_v2  ;;  %v37_v6 = vld [vmem:[%s4629_s0 + $0x18] sm:$0xff]  ;;  %v158_v9 = vld [vmem:[%s4627_s1 + $0x1d0] sm:$0xff]  ;;  %v39_v10 = vld [vmem:[%s4629_s0 + $0x28] sm:$0xff] }
  0x19   :  { %2927 = vmatprep.mubr.msk.f32.mxu0 %vm165_vm0, %v112_v16  ;;  %2970 = vmatmul.mubr.msk.f32.gmra.mrb[8].mxu1 %vm165_vm0, %v141_v34  ;;  %v40_v11 = vld [vmem:[%s4629_s0 + $0x30] sm:$0xff]  ;;  %v159_v12 = vld [vmem:[%s4627_s1 + $0x1d8] sm:$0xff]  ;;  %v160_v13 = vld [vmem:[%s4627_s1 + $0x1e0] sm:$0xff] }
  0x1a   :  { %2972 = vmatprep.mubr.msk.f32.mxu1 %vm165_vm0, %v142_v35  ;;  %3216 = vmatpush3.bf16.msra.mxu1 %v3213_v2  ;;  %v41_v14 = vld [vmem:[%s4629_s0 + $0x38] sm:$0xff]  ;;  %v42_v15 = vld [vmem:[%s4629_s0 + $0x40] sm:$0xff]  ;;  %v161_v16 = vld [vmem:[%s4627_s1 + $0x1e8] sm:$0xff] }
  0x1b   :  { %3218 = vmatprep.subr.bf16.mxu1 %v3217_v5  ;;  %v162_v17 = vld [vmem:[%s4627_s1 + $0x1f0] sm:$0xff]  ;;  %v43_v18 = vld [vmem:[%s4629_s0 + $0x48] sm:$0xff]  ;;  %v46_v22 = vld [vmem:[%s4629_s0 + $0x60] sm:$0xff] }
  0x1c   :  { %2928 = vmatmul.mubr.msk.f32.gmra.mrb[12].mxu0 %vm165_vm0, %v113_v20  ;;  %v44_v19 = vld [vmem:[%s4629_s0 + $0x50] sm:$0xff]  ;;  %v163_v20 = vld [vmem:[%s4627_s1 + $0x1f8] sm:$0xff]  ;;  %v47_v23 = vld [vmem:[%s4629_s0 + $0x68] sm:$0xff] }
  0x1d   :  { %2930 = vmatprep.mubr.msk.f32.mxu0 %vm165_vm0, %v114_v21  ;;  %2973 = vmatmul.mubr.msk.f32.gmra.mrb[10].mxu1 %vm165_vm0, %v143_v38  ;;  %v45_v21 = vld [vmem:[%s4629_s0 + $0x58] sm:$0xff]  ;;  %v50_v26 = vld [vmem:[%s4629_s0 + $0x80] sm:$0xff]  ;;  %v51_v27 = vld [vmem:[%s4629_s0 + $0x88] sm:$0xff] }
  0x1e   :  { %2975 = vmatprep.mubr.msk.f32.mxu1 %vm165_vm0, %v144_v39  ;;  %3220 = vmatpush3.bf16.msra.mxu1 %v3217_v5  ;;  %v54_v30 = vld [vmem:[%s4629_s0 + $0xa0] sm:$0xff]  ;;  %v55_v31 = vld [vmem:[%s4629_s0 + $0xa8] sm:$0xff]  ;;  %v85_v61 = vld [vmem:[%s4629_s0 + $0x198] sm:$0xff] }
  0x1f   :  { %v58_v34 = vld [vmem:[%s4629_s0 + $0xc0] sm:$0xff]  ;;  %v59_v35 = vld [vmem:[%s4629_s0 + $0xc8] sm:$0xff]  ;;  %v93_v5 = vld [vmem:[%s4629_s0 + $0x1d8] sm:$0xff] }
  0x20   :  { %2931 = vmatmul.mubr.msk.f32.gmra.mrb[14].mxu0 %vm165_vm0, %v115_v24  ;;  %v48_v24 = vld [vmem:[%s4629_s0 + $0x70] sm:$0xff]  ;;  %v62_v38 = vld [vmem:[%s4629_s0 + $0xe0] sm:$0xff]  ;;  %v63_v39 = vld [vmem:[%s4629_s0 + $0xe8] sm:$0xff] }
  0x21   :  { %2933 = vmatprep.mubr.msk.f32.mxu0 %vm165_vm0, %v116_v25  ;;  %2976 = vmatmul.mubr.msk.f32.gmra.mrb[12].mxu1 %vm165_vm0, %v145_v42  ;;  %v49_v25 = vld [vmem:[%s4629_s0 + $0x78] sm:$0xff]  ;;  %v66_v42 = vld [vmem:[%s4629_s0 + $0x100] sm:$0xff]  ;;  %v87_v63 = vld [vmem:[%s4629_s0 + $0x1a8] sm:$0xff] }
  0x22   :  { %2978 = vmatprep.mubr.msk.f32.mxu1 %vm165_vm0, %v146_v43  ;;  %v67_v43 = vld [vmem:[%s4629_s0 + $0x108] sm:$0xff]  ;;  %v86_v62 = vld [vmem:[%s4629_s0 + $0x1a0] sm:$0xff] }
  0x23   :  { %v90_v2 = vld [vmem:[%s4629_s0 + $0x1c0] sm:$0xff]  ;;  %v91_v3 = vld [vmem:[%s4629_s0 + $0x1c8] sm:$0xff] }
  0x24   :  { %2934 = vmatmul.mubr.msk.f32.gmra.mrb[16].mxu0 %vm165_vm0, %v117_v28  ;;  %v52_v28 = vld [vmem:[%s4629_s0 + $0x90] sm:$0xff] }
  0x25   :  { %2936 = vmatprep.mubr.msk.f32.mxu0 %vm165_vm0, %v118_v29  ;;  %2979 = vmatmul.mubr.msk.f32.gmra.mrb[14].mxu1 %vm165_vm0, %v147_v46  ;;  %v53_v29 = vld [vmem:[%s4629_s0 + $0x98] sm:$0xff]  ;;  %v70_v46 = vld [vmem:[%s4629_s0 + $0x120] sm:$0xff] }
  0x26   :  { %2981 = vmatprep.mubr.msk.f32.mxu1 %vm165_vm0, %v148_v47  ;;  %v71_v47 = vld [vmem:[%s4629_s0 + $0x128] sm:$0xff] }
  0x28   :  { %2937 = vmatmul.mubr.msk.f32.gmra.mrb[18].mxu0 %vm165_vm0, %v119_v32  ;;  %v56_v32 = vld [vmem:[%s4629_s0 + $0xb0] sm:$0xff] }
  0x29   :  { %2939 = vmatprep.mubr.msk.f32.mxu0 %vm165_vm0, %v120_v33  ;;  %2982 = vmatmul.mubr.msk.f32.gmra.mrb[16].mxu1 %vm165_vm0, %v149_v50  ;;  %v57_v33 = vld [vmem:[%s4629_s0 + $0xb8] sm:$0xff]  ;;  %v74_v50 = vld [vmem:[%s4629_s0 + $0x140] sm:$0xff] }
  0x2a   :  { %2984 = vmatprep.mubr.msk.f32.mxu1 %vm165_vm0, %v150_v51  ;;  %v75_v51 = vld [vmem:[%s4629_s0 + $0x148] sm:$0xff] }
  0x2c   :  { %2940 = vmatmul.mubr.msk.f32.gmra.mrb[20].mxu0 %vm165_vm0, %v121_v36  ;;  %v60_v36 = vld [vmem:[%s4629_s0 + $0xd0] sm:$0xff] }
  0x2d   :  { %2942 = vmatprep.mubr.msk.f32.mxu0 %vm165_vm0, %v122_v37  ;;  %2985 = vmatmul.mubr.msk.f32.gmra.mrb[18].mxu1 %vm165_vm0, %v151_v54  ;;  %v61_v37 = vld [vmem:[%s4629_s0 + $0xd8] sm:$0xff]  ;;  %v78_v54 = vld [vmem:[%s4629_s0 + $0x160] sm:$0xff] }
  0x2e   :  { %2987 = vmatprep.mubr.msk.f32.mxu1 %vm165_vm0, %v152_v55  ;;  %v79_v55 = vld [vmem:[%s4629_s0 + $0x168] sm:$0xff] }
  0x30   :  { %2943 = vmatmul.mubr.msk.f32.gmra.mrb[22].mxu0 %vm165_vm0, %v123_v40  ;;  %v64_v40 = vld [vmem:[%s4629_s0 + $0xf0] sm:$0xff] }
  0x31   :  { %2945 = vmatprep.mubr.msk.f32.mxu0 %vm165_vm0, %v124_v41  ;;  %2988 = vmatmul.mubr.msk.f32.gmra.mrb[20].mxu1 %vm165_vm0, %v153_v58  ;;  %v65_v41 = vld [vmem:[%s4629_s0 + $0xf8] sm:$0xff]  ;;  %v82_v58 = vld [vmem:[%s4629_s0 + $0x180] sm:$0xff] }
  0x32   :  { %2990 = vmatprep.mubr.msk.f32.mxu1 %vm165_vm0, %v154_v59  ;;  %v83_v59 = vld [vmem:[%s4629_s0 + $0x188] sm:$0xff] }
  0x34   :  { %2946 = vmatmul.mubr.msk.f32.gmra.mrb[24].mxu0 %vm165_vm0, %v125_v44  ;;  %v68_v44 = vld [vmem:[%s4629_s0 + $0x110] sm:$0xff] }
  0x35   :  { %2948 = vmatprep.mubr.msk.f32.mxu0 %vm165_vm0, %v126_v45  ;;  %2991 = vmatmul.mubr.msk.f32.gmra.mrb[22].mxu1 %vm165_vm0, %v155_v1  ;;  %v69_v45 = vld [vmem:[%s4629_s0 + $0x118] sm:$0xff] }
  0x36   :  { %2993 = vmatprep.mubr.msk.f32.mxu1 %vm165_vm0, %v156_v4  ;;  %v89_v1 = vld [vmem:[%s4629_s0 + $0x1b8] sm:$0xff]  ;;  %v92_v4 = vld [vmem:[%s4629_s0 + $0x1d0] sm:$0xff] }
  0x38   :  { %2949 = vmatmul.mubr.msk.f32.gmra.mrb[26].mxu0 %vm165_vm0, %v127_v48  ;;  %v72_v48 = vld [vmem:[%s4629_s0 + $0x130] sm:$0xff] }
  0x39   :  { %2951 = vmatprep.mubr.msk.f32.mxu0 %vm165_vm0, %v128_v49  ;;  %2994 = vmatmul.mubr.msk.f32.gmra.mrb[24].mxu1 %vm165_vm0, %v157_v8  ;;  %v73_v49 = vld [vmem:[%s4629_s0 + $0x138] sm:$0xff]  ;;  %v96_v8 = vld [vmem:[%s4629_s0 + $0x1f0] sm:$0xff] }
  0x3a   :  { %2996 = vmatprep.mubr.msk.f32.mxu1 %vm165_vm0, %v158_v9  ;;  %v97_v9 = vld [vmem:[%s4629_s0 + $0x1f8] sm:$0xff] }
  0x3c   :  { %2952 = vmatmul.mubr.msk.f32.gmra.mrb[28].mxu0 %vm165_vm0, %v129_v52  ;;  %v76_v52 = vld [vmem:[%s4629_s0 + $0x150] sm:$0xff] }
  0x3d   :  { %2954 = vmatprep.mubr.msk.f32.mxu0 %vm165_vm0, %v130_v53  ;;  %2997 = vmatmul.mubr.msk.f32.gmra.mrb[26].mxu1 %vm165_vm0, %v159_v12  ;;  %v77_v53 = vld [vmem:[%s4629_s0 + $0x158] sm:$0xff] }
  0x3e   :  { %2999 = vmatprep.mubr.msk.f32.mxu1 %vm165_vm0, %v160_v13 }
  0x40   :  { %2955 = vmatmul.mubr.msk.f32.gmra.mrb[30].mxu0 %vm165_vm0, %v131_v56  ;;  %v80_v56 = vld [vmem:[%s4629_s0 + $0x170] sm:$0xff] }
  0x41   :  { %3009 = vmatprep.mubr.msk.f32.mxu0 %vm743_vm1, %v34_v57  ;;  %3000 = vmatmul.mubr.msk.f32.gmra.mrb[28].mxu1 %vm165_vm0, %v161_v16  ;;  %v81_v57 = vld [vmem:[%s4629_s0 + $0x178] sm:$0xff] }
  0x42   :  { %3002 = vmatprep.mubr.msk.f32.mxu1 %vm165_vm0, %v162_v17 }
  0x44   :  { %3010 = vmatmul.mubr.msk.f32.vlgmr.msra.gmra.mrb[0].mxu0 %vm743_vm1, %v35_v60  ;;  %v84_v60 = vld [vmem:[%s4629_s0 + $0x190] sm:$0xff] }
  0x45   :  { %3012 = vmatprep.mubr.msk.f32.mxu0 %vm743_vm1, %v36_v0  ;;  %3003 = vmatmul.mubr.msk.f32.gmra.mrb[30].mxu1 %vm165_vm0, %v163_v20  ;;  %v88_v0 = vld [vmem:[%s4629_s0 + $0x1b0] sm:$0xff] }
  0x48   :  { %3013 = vmatmul.mubr.msk.f32.gmra.mrb[2].mxu0 %vm743_vm1, %v37_v6  ;;  %v94_v6 = vld [vmem:[%s4629_s0 + $0x1e0] sm:$0xff] }
  0x49   :  { %3015 = vmatprep.mubr.msk.f32.mxu0 %vm743_vm1, %v38_v7  ;;  %v95_v7 = vld [vmem:[%s4629_s0 + $0x1e8] sm:$0xff] }
  0x4c   :  { %3016 = vmatmul.mubr.msk.f32.gmra.mrb[4].mxu0 %vm743_vm1, %v39_v10 }
  0x4d   :  { %3018 = vmatprep.mubr.msk.f32.mxu0 %vm743_vm1, %v40_v11 }
  0x50   :  { %3019 = vmatmul.mubr.msk.f32.gmra.mrb[6].mxu0 %vm743_vm1, %v41_v14 }
  0x51   :  { %3021 = vmatprep.mubr.msk.f32.mxu0 %vm743_vm1, %v42_v15 }
  0x54   :  { %3022 = vmatmul.mubr.msk.f32.gmra.mrb[8].mxu0 %vm743_vm1, %v43_v18 }
  0x55   :  { %3024 = vmatprep.mubr.msk.f32.mxu0 %vm743_vm1, %v44_v19 }
  0x58   :  { %3025 = vmatmul.mubr.msk.f32.gmra.mrb[10].mxu0 %vm743_vm1, %v45_v21 }
  0x59   :  { %3027 = vmatprep.mubr.msk.f32.mxu0 %vm743_vm1, %v46_v22 }
  0x5c   :  { %3028 = vmatmul.mubr.msk.f32.gmra.mrb[12].mxu0 %vm743_vm1, %v47_v23 }
  0x5d   :  { %3030 = vmatprep.mubr.msk.f32.mxu0 %vm743_vm1, %v48_v24 }
  0x60   :  { %3031 = vmatmul.mubr.msk.f32.gmra.mrb[14].mxu0 %vm743_vm1, %v49_v25 }
  0x61   :  { %3033 = vmatprep.mubr.msk.f32.mxu0 %vm743_vm1, %v50_v26 }
  0x64   :  { %3034 = vmatmul.mubr.msk.f32.gmra.mrb[16].mxu0 %vm743_vm1, %v51_v27 }
  0x65   :  { %3036 = vmatprep.mubr.msk.f32.mxu0 %vm743_vm1, %v52_v28 }
  0x68   :  { %3037 = vmatmul.mubr.msk.f32.gmra.mrb[18].mxu0 %vm743_vm1, %v53_v29 }
  0x69   :  { %3039 = vmatprep.mubr.msk.f32.mxu0 %vm743_vm1, %v54_v30 }
  0x6c   :  { %3040 = vmatmul.mubr.msk.f32.gmra.mrb[20].mxu0 %vm743_vm1, %v55_v31  ;;  %v3915_v31 = vld [vmem:[%s4631_s4] ss:$0 sm:$0xff] }
  0x6d   :  { %3042 = vmatprep.mubr.msk.f32.mxu0 %vm743_vm1, %v56_v32 }
  0x70   :  { %3043 = vmatmul.mubr.msk.f32.gmra.mrb[22].mxu0 %vm743_vm1, %v57_v33 }
  0x71   :  { %3045 = vmatprep.mubr.msk.f32.mxu0 %vm743_vm1, %v58_v34 }
  0x74   :  { %3046 = vmatmul.mubr.msk.f32.gmra.mrb[24].mxu0 %vm743_vm1, %v59_v35 }
  0x75   :  { %3048 = vmatprep.mubr.msk.f32.mxu0 %vm743_vm1, %v60_v36 }
  0x78   :  { %3049 = vmatmul.mubr.msk.f32.gmra.mrb[26].mxu0 %vm743_vm1, %v61_v37 }
  0x79   :  { %3051 = vmatprep.mubr.msk.f32.mxu0 %vm743_vm1, %v62_v38 }
  0x7c   :  { %3052 = vmatmul.mubr.msk.f32.gmra.mrb[28].mxu0 %vm743_vm1, %v63_v39 }
  0x7d   :  { %3054 = vmatprep.mubr.msk.f32.mxu0 %vm743_vm1, %v64_v40 }
  0x80   :  { %3055 = vmatmul.mubr.msk.f32.gmra.mrb[30].mxu0 %vm743_vm1, %v65_v41 }
  0x81   :  { %3057 = vmatprep.mubr.msk.f32.mxu0 %vm743_vm1, %v66_v42 }
  0x84   :  { %3058 = vmatmul.mubr.msk.f32.gmra.mrb[32].mxu0 %vm743_vm1, %v67_v43 }
  0x85   :  { %3060 = vmatprep.mubr.msk.f32.mxu0 %vm743_vm1, %v68_v44 }
  0x88   :  { %3061 = vmatmul.mubr.msk.f32.gmra.mrb[34].mxu0 %vm743_vm1, %v69_v45 }
  0x89   :  { %3063 = vmatprep.mubr.msk.f32.mxu0 %vm743_vm1, %v70_v46 }
  0x8c   :  { %3064 = vmatmul.mubr.msk.f32.gmra.mrb[36].mxu0 %vm743_vm1, %v71_v47 }
  0x8d   :  { %3066 = vmatprep.mubr.msk.f32.mxu0 %vm743_vm1, %v72_v48 }
  0x90   :  { %3067 = vmatmul.mubr.msk.f32.gmra.mrb[38].mxu0 %vm743_vm1, %v73_v49 }
  0x91   :  { %3069 = vmatprep.mubr.msk.f32.mxu0 %vm743_vm1, %v74_v50 }
  0x94   :  { %3070 = vmatmul.mubr.msk.f32.gmra.mrb[40].mxu0 %vm743_vm1, %v75_v51 }
  0x95   :  { %3072 = vmatprep.mubr.msk.f32.mxu0 %vm743_vm1, %v76_v52 }
  0x98   :  { %3073 = vmatmul.mubr.msk.f32.gmra.mrb[42].mxu0 %vm743_vm1, %v77_v53 }
  0x99   :  { %3075 = vmatprep.mubr.msk.f32.mxu0 %vm743_vm1, %v78_v54 }
  0x9c   :  { %3076 = vmatmul.mubr.msk.f32.gmra.mrb[44].mxu0 %vm743_vm1, %v79_v55 }
  0x9d   :  { %3078 = vmatprep.mubr.msk.f32.mxu0 %vm743_vm1, %v80_v56 }
  0xa0   :  { %3079 = vmatmul.mubr.msk.f32.gmra.mrb[46].mxu0 %vm743_vm1, %v81_v57 }
  0xa1   :  { %3081 = vmatprep.mubr.msk.f32.mxu0 %vm743_vm1, %v82_v58 }
  0xa4   :  { %3082 = vmatmul.mubr.msk.f32.gmra.mrb[48].mxu0 %vm743_vm1, %v83_v59 }
  0xa5   :  { %3084 = vmatprep.mubr.msk.f32.mxu0 %vm743_vm1, %v84_v60 }
  0xa8   :  { %3085 = vmatmul.mubr.msk.f32.gmra.mrb[50].mxu0 %vm743_vm1, %v85_v61 }
  0xa9   :  { %3087 = vmatprep.mubr.msk.f32.mxu0 %vm743_vm1, %v86_v62 }
  0xac   :  { %3088 = vmatmul.mubr.msk.f32.gmra.mrb[52].mxu0 %vm743_vm1, %v87_v63 }
  0xad   :  { %3090 = vmatprep.mubr.msk.f32.mxu0 %vm743_vm1, %v88_v0 }
  0xb0   :  { %3091 = vmatmul.mubr.msk.f32.gmra.mrb[54].mxu0 %vm743_vm1, %v89_v1 }
  0xb1   :  { %3093 = vmatprep.mubr.msk.f32.mxu0 %vm743_vm1, %v90_v2 }
  0xb4   :  { %3094 = vmatmul.mubr.msk.f32.gmra.mrb[56].mxu0 %vm743_vm1, %v91_v3 }
  0xb5   :  { %3096 = vmatprep.mubr.msk.f32.mxu0 %vm743_vm1, %v92_v4 }
  0xb8   :  { %3097 = vmatmul.mubr.msk.f32.gmra.mrb[58].mxu0 %vm743_vm1, %v93_v5 }
  0xb9   :  { %3099 = vmatprep.mubr.msk.f32.mxu0 %vm743_vm1, %v94_v6 }
  0xbc   :  { %3100 = vmatmul.mubr.msk.f32.gmra.mrb[60].mxu0 %vm743_vm1, %v95_v7 }
  0xbd   :  { %3102 = vmatprep.mubr.msk.f32.mxu0 %vm743_vm1, %v96_v8 }
  0xc0   :  { %3103 = vmatmul.mubr.msk.f32.gmra.mrb[62].mxu0 %vm743_vm1, %v97_v9 }
  0xdc   :  { %v3870_v10 = vpop.f32.mrb[0].mxu1 }
  0xdd   :  { %v3872_v11 = vpop.f32.mrb[1].mxu1 }
  0xe0   :  { %v3874_v12 = vpop.f32.mrb[2].mxu1 }
  0xe1   :  { %v3876_v13 = vpop.f32.mrb[3].mxu1 }
  0xe4   :  { %v3878_v14 = vpop.f32.mrb[4].mxu1 }
  0xe5   :  { %v3880_v15 = vpop.f32.mrb[5].mxu1 }
  0xe8   :  { %v3882_v16 = vpop.f32.mrb[6].mxu1 }
  0xe9   :  { %v3884_v17 = vpop.f32.mrb[7].mxu1 }
  0xec   :  { %v3886_v18 = vpop.f32.mrb[8].mxu1 }
  0xed   :  { %v3888_v19 = vpop.f32.mrb[9].mxu1 }
  0xf0   :  { %v3890_v20 = vpop.f32.mrb[10].mxu1 }
  0xf1   :  { %v3892_v21 = vpop.f32.mrb[11].mxu1 }
  0xf4   :  { %v3894_v22 = vpop.f32.mrb[12].mxu1 }
  0xf5   :  { %v3896_v23 = vpop.f32.mrb[13].mxu1 }
  0xf8   :  { %v3898_v24 = vpop.f32.mrb[14].mxu1 }
  0xf9   :  { %v3900_v25 = vpop.f32.mrb[15].mxu1 }
  0xfc   :  { %v3902_v26 = vpop.f32.mrb[16].mxu1 }
  0xfd   :  { %v3904_v27 = vpop.f32.mrb[17].mxu1 }
 0x100   :  { %v3906_v28 = vpop.f32.mrb[18].mxu1 }
 0x101   :  { %v3908_v29 = vpop.f32.mrb[19].mxu1 }
 0x104   :  { %v3910_v30 = vpop.f32.mrb[20].mxu1 }
 0x105   :  { %v3917_v32 = vpop.f32.mrb[21].mxu1 }
 0x108   :  { %v3920_v36 = vpop.f32.mrb[22].mxu1 }
 0x109   :  { %v3923_v38 = vpop.f32.mrb[23].mxu1 }
 0x10c   :  { %v3926_v44 = vpop.f32.mrb[24].mxu1 }
 0x10d   :  { %v3930_v46 = vpop.f32.mrb[25].mxu1 }
 0x110   :  { %v3934_v52 = vpop.f32.mrb[26].mxu1 }
 0x111   :  { %v3938_v54 = vpop.f32.mrb[27].mxu1 }
 0x114   :  { %v3942_v60 = vpop.f32.mrb[28].mxu1 }
 0x115   :  { %v3946_v62 = vpop.f32.mrb[29].mxu1 }
 0x117   :  { %v3011_v33 = vpop.f32.mrb[0].mxu0 }
 0x118   :  { %v1329_v34 = vadd.f32 %v3011_v33, %v3915_v31  ;;  %v1002_v35 = vpop.f32.mrb[1].mxu0  ;;  %v3950_v4 = vpop.f32.mrb[30].mxu1 }
 0x119   :  { %v1328_v37 = vadd.f32 %v3915_v31, %v1002_v35  ;;  %v3954_v6 = vpop.f32.mrb[31].mxu1 }
 0x11a   :  { %v1393_v41 = vmax.f32 %v1329_v34, 0.0 }
 0x11b   :  { %v1392_v39 = vmax.f32 %v1328_v37, 0.0  ;;  %v3014_v40 = vpop.f32.mrb[2].mxu0 }
 0x11c   :  { %v1331_v42 = vadd.f32 %v3014_v40, %v3915_v31  ;;  %v1012_v43 = vpop.f32.mrb[3].mxu0 }
 0x11d   :  { %v1330_v45 = vadd.f32 %v3915_v31, %v1012_v43  ;;  %3113 = vmatprep.mubr.msk.f32.mxu1 %vm1467_vm2, %v1392_v39 }
 0x11e   :  { %3114 = vmatmul.mubr.msk.f32.vlgmr.msra.gmra.mrb[32].mxu1 %vm1467_vm2, %v1393_v41  ;;  %v1395_v49 = vmax.f32 %v1331_v42, 0.0 }
 0x11f   :  { %v1394_v47 = vmax.f32 %v1330_v45, 0.0  ;;  %v3017_v48 = vpop.f32.mrb[4].mxu0 }
 0x120   :  { %v1333_v50 = vadd.f32 %v3017_v48, %v3915_v31  ;;  %v1022_v51 = vpop.f32.mrb[5].mxu0 }
 0x121   :  { %v1332_v53 = vadd.f32 %v3915_v31, %v1022_v51  ;;  %3116 = vmatprep.mubr.msk.f32.mxu1 %vm1467_vm2, %v1394_v47 }
 0x122   :  { %3117 = vmatmul.mubr.msk.f32.gmra.mrb[34].mxu1 %vm1467_vm2, %v1395_v49  ;;  %v1397_v57 = vmax.f32 %v1333_v50, 0.0 }
 0x123   :  { %v1396_v55 = vmax.f32 %v1332_v53, 0.0  ;;  %v3020_v56 = vpop.f32.mrb[6].mxu0 }
 0x124   :  { %v1335_v58 = vadd.f32 %v3020_v56, %v3915_v31  ;;  %v1032_v59 = vpop.f32.mrb[7].mxu0 }
 0x125   :  { %v1334_v61 = vadd.f32 %v3915_v31, %v1032_v59  ;;  %3119 = vmatprep.mubr.msk.f32.mxu1 %vm1467_vm2, %v1396_v55 }
 0x126   :  { %3120 = vmatmul.mubr.msk.f32.gmra.mrb[36].mxu1 %vm1467_vm2, %v1397_v57  ;;  %v1399_v1 = vmax.f32 %v1335_v58, 0.0 }
 0x127   :  { %v1398_v63 = vmax.f32 %v1334_v61, 0.0  ;;  %v3023_v0 = vpop.f32.mrb[8].mxu0 }
 0x128   :  { %v1337_v2 = vadd.f32 %v3023_v0, %v3915_v31  ;;  %v1042_v3 = vpop.f32.mrb[9].mxu0 }
 0x129   :  { %v1336_v5 = vadd.f32 %v3915_v31, %v1042_v3  ;;  %3122 = vmatprep.mubr.msk.f32.mxu1 %vm1467_vm2, %v1398_v63 }
 0x12a   :  { %3123 = vmatmul.mubr.msk.f32.gmra.mrb[38].mxu1 %vm1467_vm2, %v1399_v1  ;;  %v1401_v9 = vmax.f32 %v1337_v2, 0.0 }
 0x12b   :  { %v1400_v7 = vmax.f32 %v1336_v5, 0.0  ;;  %v3026_v8 = vpop.f32.mrb[10].mxu0 }
 0x12c   :  { %v1339_v33 = vadd.f32 %v3026_v8, %v3915_v31  ;;  %v1052_v34 = vpop.f32.mrb[11].mxu0 }
 0x12d   :  { %v1338_v35 = vadd.f32 %v3915_v31, %v1052_v34  ;;  %3125 = vmatprep.mubr.msk.f32.mxu1 %vm1467_vm2, %v1400_v7 }
 0x12e   :  { %3126 = vmatmul.mubr.msk.f32.gmra.mrb[40].mxu1 %vm1467_vm2, %v1401_v9  ;;  %v1403_v40 = vmax.f32 %v1339_v33, 0.0 }
 0x12f   :  { %v1402_v37 = vmax.f32 %v1338_v35, 0.0  ;;  %v3029_v39 = vpop.f32.mrb[12].mxu0 }
 0x130   :  { %v1341_v41 = vadd.f32 %v3029_v39, %v3915_v31  ;;  %v1062_v42 = vpop.f32.mrb[13].mxu0 }
 0x131   :  { %v1340_v43 = vadd.f32 %v3915_v31, %v1062_v42  ;;  %3128 = vmatprep.mubr.msk.f32.mxu1 %vm1467_vm2, %v1402_v37 }
 0x132   :  { %3129 = vmatmul.mubr.msk.f32.gmra.mrb[42].mxu1 %vm1467_vm2, %v1403_v40  ;;  %v1405_v48 = vmax.f32 %v1341_v41, 0.0 }
 0x133   :  { %v1404_v45 = vmax.f32 %v1340_v43, 0.0  ;;  %v3032_v47 = vpop.f32.mrb[14].mxu0 }
 0x134   :  { %v1343_v49 = vadd.f32 %v3032_v47, %v3915_v31  ;;  %v1072_v50 = vpop.f32.mrb[15].mxu0 }
 0x135   :  { %v1342_v51 = vadd.f32 %v3915_v31, %v1072_v50  ;;  %3131 = vmatprep.mubr.msk.f32.mxu1 %vm1467_vm2, %v1404_v45 }
 0x136   :  { %3132 = vmatmul.mubr.msk.f32.gmra.mrb[44].mxu1 %vm1467_vm2, %v1405_v48  ;;  %v1407_v56 = vmax.f32 %v1343_v49, 0.0 }
 0x137   :  { %v1406_v53 = vmax.f32 %v1342_v51, 0.0  ;;  %v3035_v55 = vpop.f32.mrb[16].mxu0 }
 0x138   :  { %v1345_v57 = vadd.f32 %v3035_v55, %v3915_v31  ;;  %v1082_v58 = vpop.f32.mrb[17].mxu0 }
 0x139   :  { %v1344_v59 = vadd.f32 %v3915_v31, %v1082_v58  ;;  %3134 = vmatprep.mubr.msk.f32.mxu1 %vm1467_vm2, %v1406_v53 }
 0x13a   :  { %3135 = vmatmul.mubr.msk.f32.gmra.mrb[46].mxu1 %vm1467_vm2, %v1407_v56  ;;  %v1409_v0 = vmax.f32 %v1345_v57, 0.0 }
 0x13b   :  { %v1408_v61 = vmax.f32 %v1344_v59, 0.0  ;;  %v3038_v63 = vpop.f32.mrb[18].mxu0 }
 0x13c   :  { %v1347_v1 = vadd.f32 %v3038_v63, %v3915_v31  ;;  %v1092_v2 = vpop.f32.mrb[19].mxu0 }
 0x13d   :  { %v1346_v3 = vadd.f32 %v3915_v31, %v1092_v2  ;;  %3137 = vmatprep.mubr.msk.f32.mxu1 %vm1467_vm2, %v1408_v61 }
 0x13e   :  { %3138 = vmatmul.mubr.msk.f32.gmra.mrb[48].mxu1 %vm1467_vm2, %v1409_v0  ;;  %v1411_v8 = vmax.f32 %v1347_v1, 0.0 }
 0x13f   :  { %v1410_v5 = vmax.f32 %v1346_v3, 0.0  ;;  %v3041_v7 = vpop.f32.mrb[20].mxu0 }
 0x140   :  { %v1349_v9 = vadd.f32 %v3041_v7, %v3915_v31  ;;  %v1102_v33 = vpop.f32.mrb[21].mxu0 }
 0x141   :  { %v1348_v34 = vadd.f32 %v3915_v31, %v1102_v33  ;;  %3140 = vmatprep.mubr.msk.f32.mxu1 %vm1467_vm2, %v1410_v5 }
 0x142   :  { %3141 = vmatmul.mubr.msk.f32.gmra.mrb[50].mxu1 %vm1467_vm2, %v1411_v8  ;;  %v1413_v39 = vmax.f32 %v1349_v9, 0.0 }
 0x143   :  { %v1412_v35 = vmax.f32 %v1348_v34, 0.0  ;;  %v3044_v37 = vpop.f32.mrb[22].mxu0 }
 0x144   :  { %v1351_v40 = vadd.f32 %v3044_v37, %v3915_v31  ;;  %v1112_v41 = vpop.f32.mrb[23].mxu0 }
 0x145   :  { %v1350_v42 = vadd.f32 %v3915_v31, %v1112_v41  ;;  %3143 = vmatprep.mubr.msk.f32.mxu1 %vm1467_vm2, %v1412_v35 }
 0x146   :  { %3144 = vmatmul.mubr.msk.f32.gmra.mrb[52].mxu1 %vm1467_vm2, %v1413_v39  ;;  %v1415_v47 = vmax.f32 %v1351_v40, 0.0 }
 0x147   :  { %v1414_v43 = vmax.f32 %v1350_v42, 0.0  ;;  %v3047_v45 = vpop.f32.mrb[24].mxu0 }
 0x148   :  { %v1353_v48 = vadd.f32 %v3047_v45, %v3915_v31  ;;  %v1122_v49 = vpop.f32.mrb[25].mxu0 }
 0x149   :  { %v1352_v50 = vadd.f32 %v3915_v31, %v1122_v49  ;;  %3146 = vmatprep.mubr.msk.f32.mxu1 %vm1467_vm2, %v1414_v43 }
 0x14a   :  { %3147 = vmatmul.mubr.msk.f32.gmra.mrb[54].mxu1 %vm1467_vm2, %v1415_v47  ;;  %v1417_v55 = vmax.f32 %v1353_v48, 0.0 }
 0x14b   :  { %v1416_v51 = vmax.f32 %v1352_v50, 0.0  ;;  %v3050_v53 = vpop.f32.mrb[26].mxu0 }
 0x14c   :  { %v1355_v56 = vadd.f32 %v3050_v53, %v3915_v31  ;;  %v1132_v57 = vpop.f32.mrb[27].mxu0 }
 0x14d   :  { %v1354_v58 = vadd.f32 %v3915_v31, %v1132_v57  ;;  %3149 = vmatprep.mubr.msk.f32.mxu1 %vm1467_vm2, %v1416_v51 }
 0x14e   :  { %3150 = vmatmul.mubr.msk.f32.gmra.mrb[56].mxu1 %vm1467_vm2, %v1417_v55  ;;  %v1419_v63 = vmax.f32 %v1355_v56, 0.0 }
 0x14f   :  { %v1418_v59 = vmax.f32 %v1354_v58, 0.0  ;;  %v3053_v61 = vpop.f32.mrb[28].mxu0 }
 0x150   :  { %v1357_v0 = vadd.f32 %v3053_v61, %v3915_v31  ;;  %v1142_v1 = vpop.f32.mrb[29].mxu0 }
 0x151   :  { %v1356_v2 = vadd.f32 %v3915_v31, %v1142_v1  ;;  %3152 = vmatprep.mubr.msk.f32.mxu1 %vm1467_vm2, %v1418_v59 }
 0x152   :  { %3153 = vmatmul.mubr.msk.f32.gmra.mrb[58].mxu1 %vm1467_vm2, %v1419_v63  ;;  %v1421_v7 = vmax.f32 %v1357_v0, 0.0 }
 0x153   :  { %v1420_v3 = vmax.f32 %v1356_v2, 0.0  ;;  %v3056_v5 = vpop.f32.mrb[30].mxu0 }
 0x154   :  { %v1359_v8 = vadd.f32 %v3056_v5, %v3915_v31  ;;  %v1152_v9 = vpop.f32.mrb[31].mxu0 }
 0x155   :  { %v1358_v33 = vadd.f32 %v3915_v31, %v1152_v9  ;;  %3155 = vmatprep.mubr.msk.f32.mxu1 %vm1467_vm2, %v1420_v3 }
 0x156   :  { %3156 = vmatmul.mubr.msk.f32.gmra.mrb[60].mxu1 %vm1467_vm2, %v1421_v7  ;;  %v1423_v37 = vmax.f32 %v1359_v8, 0.0 }
 0x157   :  { %v1422_v34 = vmax.f32 %v1358_v33, 0.0  ;;  %v3059_v35 = vpop.f32.mrb[32].mxu0 }
 0x158   :  { %v1168_v39 = vadd.f32 %v3059_v35, %v3870_v10  ;;  %v1162_v40 = vpop.f32.mrb[33].mxu0 }
 0x159   :  { %v1163_v41 = vadd.f32 %v1162_v40, %v3872_v11  ;;  %3158 = vmatprep.mubr.msk.f32.mxu1 %vm1467_vm2, %v1422_v34 }
 0x15a   :  { %v1361_v42 = vadd.f32 %v3915_v31, %v1168_v39  ;;  %3159 = vmatmul.mubr.msk.f32.gmra.mrb[62].mxu1 %vm1467_vm2, %v1423_v37 }
 0x15b   :  { %v1360_v43 = vadd.f32 %v3915_v31, %v1163_v41  ;;  %v3062_v45 = vpop.f32.mrb[34].mxu0 }
 0x15c   :  { %v1425_v47 = vmax.f32 %v1361_v42, 0.0  ;;  %v1178_v48 = vadd.f32 %v3062_v45, %v3874_v12  ;;  %v1172_v49 = vpop.f32.mrb[35].mxu0 }
 0x15d   :  { %v1424_v50 = vmax.f32 %v1360_v43, 0.0  ;;  %v1173_v51 = vadd.f32 %v1172_v49, %v3876_v13 }
 0x15e   :  { %v1363_v10 = vadd.f32 %v3915_v31, %v1178_v48 }
 0x15f   :  { %v1362_v11 = vadd.f32 %v3915_v31, %v1173_v51  ;;  %v3065_v53 = vpop.f32.mrb[36].mxu0  ;;  %3161 = vmatprep.mubr.msk.f32.mxu1 %vm1467_vm2, %v1424_v50 }
 0x160   :  { %v1427_v55 = vmax.f32 %v1363_v10, 0.0  ;;  %v1188_v56 = vadd.f32 %v3065_v53, %v3878_v14  ;;  %v1182_v57 = vpop.f32.mrb[37].mxu0  ;;  %3162 = vmatmul.mubr.msk.f32.gmra.mrb[64].mxu1 %vm1467_vm2, %v1425_v47 }
 0x161   :  { %v1426_v58 = vmax.f32 %v1362_v11, 0.0  ;;  %v1183_v12 = vadd.f32 %v1182_v57, %v3880_v15 }
 0x162   :  { %v1365_v59 = vadd.f32 %v3915_v31, %v1188_v56 }
 0x163   :  { %v1364_v13 = vadd.f32 %v3915_v31, %v1183_v12  ;;  %v3068_v61 = vpop.f32.mrb[38].mxu0  ;;  %3164 = vmatprep.mubr.msk.f32.mxu1 %vm1467_vm2, %v1426_v58 }
 0x164   :  { %v1429_v63 = vmax.f32 %v1365_v59, 0.0  ;;  %v1198_v0 = vadd.f32 %v3068_v61, %v3882_v16  ;;  %v1192_v1 = vpop.f32.mrb[39].mxu0  ;;  %3165 = vmatmul.mubr.msk.f32.gmra.mrb[66].mxu1 %vm1467_vm2, %v1427_v55 }
 0x165   :  { %v1428_v14 = vmax.f32 %v1364_v13, 0.0  ;;  %v1193_v2 = vadd.f32 %v1192_v1, %v3884_v17 }
 0x166   :  { %v1367_v3 = vadd.f32 %v3915_v31, %v1198_v0 }
 0x167   :  { %v1366_v15 = vadd.f32 %v3915_v31, %v1193_v2  ;;  %v3071_v5 = vpop.f32.mrb[40].mxu0  ;;  %3167 = vmatprep.mubr.msk.f32.mxu1 %vm1467_vm2, %v1428_v14 }
 0x168   :  { %v1431_v7 = vmax.f32 %v1367_v3, 0.0  ;;  %v1208_v8 = vadd.f32 %v3071_v5, %v3886_v18  ;;  %v1202_v9 = vpop.f32.mrb[41].mxu0  ;;  %3168 = vmatmul.mubr.msk.f32.gmra.mrb[68].mxu1 %vm1467_vm2, %v1429_v63 }
 0x169   :  { %v1430_v16 = vmax.f32 %v1366_v15, 0.0  ;;  %v1203_v33 = vadd.f32 %v1202_v9, %v3888_v19 }
 0x16a   :  { %v1369_v34 = vadd.f32 %v3915_v31, %v1208_v8 }
 0x16b   :  { %v1368_v17 = vadd.f32 %v3915_v31, %v1203_v33  ;;  %v3074_v35 = vpop.f32.mrb[42].mxu0  ;;  %3170 = vmatprep.mubr.msk.f32.mxu1 %vm1467_vm2, %v1430_v16 }
 0x16c   :  { %v1433_v37 = vmax.f32 %v1369_v34, 0.0  ;;  %v1218_v39 = vadd.f32 %v3074_v35, %v3890_v20  ;;  %v1212_v40 = vpop.f32.mrb[43].mxu0  ;;  %3171 = vmatmul.mubr.msk.f32.gmra.mrb[70].mxu1 %vm1467_vm2, %v1431_v7 }
 0x16d   :  { %v1432_v18 = vmax.f32 %v1368_v17, 0.0  ;;  %v1213_v41 = vadd.f32 %v1212_v40, %v3892_v21 }
 0x16e   :  { %v1371_v42 = vadd.f32 %v3915_v31, %v1218_v39 }
 0x16f   :  { %v1370_v19 = vadd.f32 %v3915_v31, %v1213_v41  ;;  %v3077_v43 = vpop.f32.mrb[44].mxu0  ;;  %3173 = vmatprep.mubr.msk.f32.mxu1 %vm1467_vm2, %v1432_v18 }
 0x170   :  { %v1435_v45 = vmax.f32 %v1371_v42, 0.0  ;;  %v1228_v47 = vadd.f32 %v3077_v43, %v3894_v22  ;;  %v1222_v48 = vpop.f32.mrb[45].mxu0  ;;  %3174 = vmatmul.mubr.msk.f32.gmra.mrb[72].mxu1 %vm1467_vm2, %v1433_v37 }
 0x171   :  { %v1434_v20 = vmax.f32 %v1370_v19, 0.0  ;;  %v1223_v49 = vadd.f32 %v1222_v48, %v3896_v23 }
 0x172   :  { %v1373_v50 = vadd.f32 %v3915_v31, %v1228_v47 }
 0x173   :  { %v1372_v21 = vadd.f32 %v3915_v31, %v1223_v49  ;;  %v3080_v51 = vpop.f32.mrb[46].mxu0  ;;  %3176 = vmatprep.mubr.msk.f32.mxu1 %vm1467_vm2, %v1434_v20 }
 0x174   :  { %v1437_v10 = vmax.f32 %v1373_v50, 0.0  ;;  %v1238_v11 = vadd.f32 %v3080_v51, %v3898_v24  ;;  %v1232_v53 = vpop.f32.mrb[47].mxu0  ;;  %3177 = vmatmul.mubr.msk.f32.gmra.mrb[74].mxu1 %vm1467_vm2, %v1435_v45 }
 0x175   :  { %v1436_v22 = vmax.f32 %v1372_v21, 0.0  ;;  %v1233_v55 = vadd.f32 %v1232_v53, %v3900_v25 }
 0x176   :  { %v1375_v56 = vadd.f32 %v3915_v31, %v1238_v11 }
 0x177   :  { %v1374_v23 = vadd.f32 %v3915_v31, %v1233_v55  ;;  %v3083_v57 = vpop.f32.mrb[48].mxu0  ;;  %3179 = vmatprep.mubr.msk.f32.mxu1 %vm1467_vm2, %v1436_v22 }
 0x178   :  { %v1439_v58 = vmax.f32 %v1375_v56, 0.0  ;;  %v1248_v12 = vadd.f32 %v3083_v57, %v3902_v26  ;;  %v1242_v59 = vpop.f32.mrb[49].mxu0  ;;  %3180 = vmatmul.mubr.msk.f32.gmra.mrb[76].mxu1 %vm1467_vm2, %v1437_v10 }
 0x179   :  { %v1438_v24 = vmax.f32 %v1374_v23, 0.0  ;;  %v1243_v13 = vadd.f32 %v1242_v59, %v3904_v27 }
 0x17a   :  { %v1377_v61 = vadd.f32 %v3915_v31, %v1248_v12 }
 0x17b   :  { %v1376_v25 = vadd.f32 %v3915_v31, %v1243_v13  ;;  %v3086_v63 = vpop.f32.mrb[50].mxu0  ;;  %3182 = vmatprep.mubr.msk.f32.mxu1 %vm1467_vm2, %v1438_v24 }
 0x17c   :  { %v1441_v0 = vmax.f32 %v1377_v61, 0.0  ;;  %v1258_v1 = vadd.f32 %v3086_v63, %v3906_v28  ;;  %v1252_v14 = vpop.f32.mrb[51].mxu0  ;;  %3183 = vmatmul.mubr.msk.f32.gmra.mrb[78].mxu1 %vm1467_vm2, %v1439_v58 }
 0x17d   :  { %v1440_v26 = vmax.f32 %v1376_v25, 0.0  ;;  %v1253_v2 = vadd.f32 %v1252_v14, %v3908_v29  ;;  %v4109_v25 = vld [vmem:[%s4633_s7] ss:$0 sm:$0xff] }
 0x17e   :  { %v1379_v3 = vadd.f32 %v3915_v31, %v1258_v1 }
 0x17f   :  { %v1378_v27 = vadd.f32 %v3915_v31, %v1253_v2  ;;  %v3089_v15 = vpop.f32.mrb[52].mxu0  ;;  %3185 = vmatprep.mubr.msk.f32.mxu1 %vm1467_vm2, %v1440_v26 }
 0x180   :  { %v1443_v5 = vmax.f32 %v1379_v3, 0.0  ;;  %v1268_v7 = vadd.f32 %v3089_v15, %v3910_v30  ;;  %v1262_v8 = vpop.f32.mrb[53].mxu0  ;;  %3186 = vmatmul.mubr.msk.f32.gmra.mrb[80].mxu1 %vm1467_vm2, %v1441_v0 }
 0x181   :  { %v1442_v28 = vmax.f32 %v1378_v27, 0.0  ;;  %v1263_v9 = vadd.f32 %v1262_v8, %v3917_v32 }
 0x182   :  { %v1381_v16 = vadd.f32 %v3915_v31, %v1268_v7 }
 0x183   :  { %v1380_v29 = vadd.f32 %v3915_v31, %v1263_v9  ;;  %v3092_v33 = vpop.f32.mrb[54].mxu0  ;;  %3188 = vmatprep.mubr.msk.f32.mxu1 %vm1467_vm2, %v1442_v28 }
 0x184   :  { %v1445_v34 = vmax.f32 %v1381_v16, 0.0  ;;  %v1278_v17 = vadd.f32 %v3092_v33, %v3920_v36  ;;  %v1272_v35 = vpop.f32.mrb[55].mxu0  ;;  %3189 = vmatmul.mubr.msk.f32.gmra.mrb[82].mxu1 %vm1467_vm2, %v1443_v5 }
 0x185   :  { %v1444_v30 = vmax.f32 %v1380_v29, 0.0  ;;  %v1273_v37 = vadd.f32 %v1272_v35, %v3923_v38  ;;  %v14_v29 = vstv %s4634_s8 }
 0x186   :  { %v1383_v39 = vadd.f32 %v3915_v31, %v1278_v17  ;;  %15 = vst [vmem:[#allocation2] sm:$0x1] %v14_v29 }
 0x187   :  { %v1382_v32 = vadd.f32 %v3915_v31, %v1273_v37  ;;  %v3095_v40 = vpop.f32.mrb[56].mxu0  ;;  %3191 = vmatprep.mubr.msk.f32.mxu1 %vm1467_vm2, %v1444_v30 }
 0x188   :  { %v1447_v18 = vmax.f32 %v1383_v39, 0.0  ;;  %v1288_v41 = vadd.f32 %v3095_v40, %v3926_v44  ;;  %v1282_v42 = vpop.f32.mrb[57].mxu0  ;;  %3192 = vmatmul.mubr.msk.f32.gmra.mrb[84].mxu1 %vm1467_vm2, %v1445_v34 }
 0x189   :  { %v1446_v36 = vmax.f32 %v1382_v32, 0.0  ;;  %v1283_v19 = vadd.f32 %v1282_v42, %v3930_v46 }
 0x18a   :  { %v1385_v43 = vadd.f32 %v3915_v31, %v1288_v41 }
 0x18b   :  { %v1384_v38 = vadd.f32 %v3915_v31, %v1283_v19  ;;  %v3098_v45 = vpop.f32.mrb[58].mxu0  ;;  %3194 = vmatprep.mubr.msk.f32.mxu1 %vm1467_vm2, %v1446_v36 }
 0x18c   :  { %v1449_v47 = vmax.f32 %v1385_v43, 0.0  ;;  %v1298_v48 = vadd.f32 %v3098_v45, %v3934_v52  ;;  %v1292_v20 = vpop.f32.mrb[59].mxu0  ;;  %3195 = vmatmul.mubr.msk.f32.gmra.mrb[86].mxu1 %vm1467_vm2, %v1447_v18 }
 0x18d   :  { %v1448_v44 = vmax.f32 %v1384_v38, 0.0  ;;  %v1293_v49 = vadd.f32 %v1292_v20, %v3938_v54 }
 0x18e   :  { %v1387_v50 = vadd.f32 %v3915_v31, %v1298_v48 }
 0x18f   :  { %v1386_v46 = vadd.f32 %v3915_v31, %v1293_v49  ;;  %v3101_v21 = vpop.f32.mrb[60].mxu0  ;;  %3197 = vmatprep.mubr.msk.f32.mxu1 %vm1467_vm2, %v1448_v44 }
 0x190   :  { %v1451_v51 = vmax.f32 %v1387_v50, 0.0  ;;  %v1308_v10 = vadd.f32 %v3101_v21, %v3942_v60  ;;  %v1302_v11 = vpop.f32.mrb[61].mxu0  ;;  %3198 = vmatmul.mubr.msk.f32.gmra.mrb[88].mxu1 %vm1467_vm2, %v1449_v47 }
 0x191   :  { %v1450_v52 = vmax.f32 %v1386_v46, 0.0  ;;  %v1303_v53 = vadd.f32 %v1302_v11, %v3946_v62 }
 0x192   :  { %v1389_v22 = vadd.f32 %v3915_v31, %v1308_v10 }
 0x193   :  { %v1388_v54 = vadd.f32 %v3915_v31, %v1303_v53  ;;  %v3104_v55 = vpop.f32.mrb[62].mxu0  ;;  %3200 = vmatprep.mubr.msk.f32.mxu1 %vm1467_vm2, %v1450_v52 }
 0x194   :  { %v1453_v56 = vmax.f32 %v1389_v22, 0.0  ;;  %v1318_v23 = vadd.f32 %v3104_v55, %v3950_v4  ;;  %v1312_v57 = vpop.f32.mrb[63].mxu0  ;;  %3201 = vmatmul.mubr.msk.f32.gmra.mrb[90].mxu1 %vm1467_vm2, %v1451_v51  ;;  %v4102_v4 = vld [vmem:[%s4632_s6] ss:$0 sm:$0xff] }
 0x195   :  { %v1452_v60 = vmax.f32 %v1388_v54, 0.0  ;;  %v1313_v58 = vadd.f32 %v1312_v57, %v3954_v6 }
 0x196   :  { %v1391_v12 = vadd.f32 %v3915_v31, %v1318_v23 }
 0x197   :  { %v1390_v62 = vadd.f32 %v3915_v31, %v1313_v58  ;;  %3203 = vmatprep.mubr.msk.f32.mxu1 %vm1467_vm2, %v1452_v60 }
 0x198   :  { %v1455_v59 = vmax.f32 %v1391_v12, 0.0  ;;  %3204 = vmatmul.mubr.msk.f32.gmra.mrb[92].mxu1 %vm1467_vm2, %v1453_v56 }
 0x199   :  { %v1454_v24 = vmax.f32 %v1390_v62, 0.0 }
 0x19b   :  { %3206 = vmatprep.mubr.msk.f32.mxu1 %vm1467_vm2, %v1454_v24 }
 0x19c   :  { %3207 = vmatmul.mubr.msk.f32.gmra.mrb[94].mxu1 %vm1467_vm2, %v1455_v59 }
 0x1f1   :  { %v3115_v6 = vpop.f32.mrb[32].mxu1 }
 0x1f2   :  { %v1732_v13 = vadd.f32 %v3115_v6, %v4102_v4  ;;  %v1726_v61 = vpop.f32.mrb[33].mxu1 }
 0x1f3   :  { %v1727_v31 = vadd.f32 %v4102_v4, %v1726_v61 }
 0x1f4   :  { %v2046_v63 = vmax.f32 %v1732_v13, 0.0 }
 0x1f5   :  { %v2045_v0 = vmax.f32 %v1727_v31, 0.0  ;;  %v3118_v1 = vpop.f32.mrb[34].mxu1 }
 0x1f6   :  { %v1742_v14 = vadd.f32 %v3118_v1, %v4102_v4  ;;  %v1736_v26 = vpop.f32.mrb[35].mxu1  ;;  %v2117_v2 = vmul.f32 %v4109_v25, %v2046_v63 }
 0x1f7   :  { %v1737_v3 = vadd.f32 %v4102_v4, %v1736_v26  ;;  %v2116_v5 = vmul.f32 %v4109_v25, %v2045_v0 }
 0x1f8   :  { %v2048_v27 = vmax.f32 %v1742_v14, 0.0  ;;  %v2183_v15 = vsel %vm1467_vm2, %v2117_v2, 0.0 }
 0x1f9   :  { %v2047_v7 = vmax.f32 %v1737_v3, 0.0  ;;  %2184 = vadd.xlane.f32.xlu0 %v2183_v15  ;;  %v3121_v8 = vpop.f32.mrb[36].mxu1  ;;  %v2180_v17 = vsel %vm1467_vm2, %v2116_v5, 0.0 }
 0x1fa   :  { %v1752_v28 = vadd.f32 %v3121_v8, %v4102_v4  ;;  %v1746_v9 = vpop.f32.mrb[37].mxu1  ;;  %v2119_v16 = vmul.f32 %v4109_v25, %v2048_v27 }
 0x1fb   :  { %v1747_v33 = vadd.f32 %v4102_v4, %v1746_v9  ;;  %v2118_v30 = vmul.f32 %v4109_v25, %v2047_v7 }
 0x1fc   :  { %v2050_v34 = vmax.f32 %v1752_v28, 0.0  ;;  %v2189_v35 = vsel %vm1467_vm2, %v2119_v16, 0.0 }
 0x1fd   :  { %v2049_v37 = vmax.f32 %v1747_v33, 0.0  ;;  %2181 = vadd.xlane.f32.xlu0 %v2180_v17  ;;  %2190 = vadd.xlane.f32.xlu1 %v2189_v35  ;;  %v3124_v39 = vpop.f32.mrb[38].mxu1  ;;  %v2186_v36 = vsel %vm1467_vm2, %v2118_v30, 0.0 }
 0x1fe   :  { %v1762_v32 = vadd.f32 %v3124_v39, %v4102_v4  ;;  %v1756_v40 = vpop.f32.mrb[39].mxu1  ;;  %v2121_v19 = vmul.f32 %v4109_v25, %v2050_v34 }
 0x1ff   :  { %v1757_v18 = vadd.f32 %v4102_v4, %v1756_v40  ;;  %v2120_v41 = vmul.f32 %v4109_v25, %v2049_v37 }
 0x200   :  { %v2052_v42 = vmax.f32 %v1762_v32, 0.0  ;;  %v2195_v50 = vsel %vm1467_vm2, %v2121_v19, 0.0 }
 0x201   :  { %v2051_v43 = vmax.f32 %v1757_v18, 0.0  ;;  %2187 = vadd.xlane.f32.xlu1 %v2186_v36  ;;  %v3127_v38 = vpop.f32.mrb[40].mxu1  ;;  %v2192_v45 = vsel %vm1467_vm2, %v2120_v41, 0.0 }
 0x202   :  { %v1772_v47 = vadd.f32 %v3127_v38, %v4102_v4  ;;  %2193 = vadd.xlane.f32.xlu0 %v2192_v45  ;;  %v1766_v48 = vpop.f32.mrb[41].mxu1  ;;  %v2123_v46 = vmul.f32 %v4109_v25, %v2052_v42 }
 0x203   :  { %v1767_v20 = vadd.f32 %v4102_v4, %v1766_v48  ;;  %v2122_v44 = vmul.f32 %v4109_v25, %v2051_v43 }
 0x204   :  { %v2054_v49 = vmax.f32 %v1772_v47, 0.0  ;;  %v2201_v55 = vsel %vm1467_vm2, %v2123_v46, 0.0 }
 0x205   :  { %v2053_v21 = vmax.f32 %v1767_v20, 0.0  ;;  %2196 = vadd.xlane.f32.xlu1 %v2195_v50  ;;  %v3130_v51 = vpop.f32.mrb[42].mxu1  ;;  %v2198_v10 = vsel %vm1467_vm2, %v2122_v44, 0.0 }
 0x206   :  { %v1782_v11 = vadd.f32 %v3130_v51, %v4102_v4  ;;  %2199 = vadd.xlane.f32.xlu0 %v2198_v10  ;;  %v1776_v52 = vpop.f32.mrb[43].mxu1  ;;  %v2125_v56 = vmul.f32 %v4109_v25, %v2054_v49 }
 0x207   :  { %v1777_v53 = vadd.f32 %v4102_v4, %v1776_v52  ;;  %v2124_v22 = vmul.f32 %v4109_v25, %v2053_v21 }
 0x208   :  { %v2056_v54 = vmax.f32 %v1782_v11, 0.0  ;;  %v2207_v6 = vsel %vm1467_vm2, %v2125_v56, 0.0 }
 0x209   :  { %v2055_v23 = vmax.f32 %v1777_v53, 0.0  ;;  %2202 = vadd.xlane.f32.xlu1 %v2201_v55  ;;  %v3133_v57 = vpop.f32.mrb[44].mxu1  ;;  %v2204_v60 = vsel %vm1467_vm2, %v2124_v22, 0.0 }
 0x20a   :  { %v1792_v58 = vadd.f32 %v3133_v57, %v4102_v4  ;;  %2205 = vadd.xlane.f32.xlu0 %v2204_v60  ;;  %v1786_v12 = vpop.f32.mrb[45].mxu1  ;;  %v2127_v13 = vmul.f32 %v4109_v25, %v2056_v54 }
 0x20b   :  { %v1787_v62 = vadd.f32 %v4102_v4, %v1786_v12  ;;  %v2126_v59 = vmul.f32 %v4109_v25, %v2055_v23 }
 0x20c   :  { %v2058_v24 = vmax.f32 %v1792_v58, 0.0  ;;  %v2213_v3 = vsel %vm1467_vm2, %v2127_v13, 0.0 }
 0x20d   :  { %v2057_v61 = vmax.f32 %v1787_v62, 0.0  ;;  %2208 = vadd.xlane.f32.xlu1 %v2207_v6  ;;  %v3136_v31 = vpop.f32.mrb[46].mxu1  ;;  %v2210_v63 = vsel %vm1467_vm2, %v2126_v59, 0.0 }
 0x20e   :  { %v1802_v0 = vadd.f32 %v3136_v31, %v4102_v4  ;;  %2211 = vadd.xlane.f32.xlu0 %v2210_v63  ;;  %v1796_v1 = vpop.f32.mrb[47].mxu1  ;;  %v2129_v27 = vmul.f32 %v4109_v25, %v2058_v24 }
 0x20f   :  { %v1797_v14 = vadd.f32 %v4102_v4, %v1796_v1  ;;  %v2128_v26 = vmul.f32 %v4109_v25, %v2057_v61 }
 0x210   :  { %v2060_v2 = vmax.f32 %v1802_v0, 0.0  ;;  %v2219_v33 = vsel %vm1467_vm2, %v2129_v27, 0.0 }
 0x211   :  { %v2059_v15 = vmax.f32 %v1797_v14, 0.0  ;;  %2214 = vadd.xlane.f32.xlu1 %v2213_v3  ;;  %v3139_v5 = vpop.f32.mrb[48].mxu1  ;;  %v2216_v7 = vsel %vm1467_vm2, %v2128_v26, 0.0 }
 0x212   :  { %v1812_v8 = vadd.f32 %v3139_v5, %v4102_v4  ;;  %2217 = vadd.xlane.f32.xlu0 %v2216_v7  ;;  %v1806_v28 = vpop.f32.mrb[49].mxu1  ;;  %v2131_v34 = vmul.f32 %v4109_v25, %v2060_v2 }
 0x213   :  { %v1807_v9 = vadd.f32 %v4102_v4, %v1806_v28  ;;  %v2130_v16 = vmul.f32 %v4109_v25, %v2059_v15 }
 0x214   :  { %v2062_v29 = vmax.f32 %v1812_v8, 0.0  ;;  %v2225_v41 = vsel %vm1467_vm2, %v2131_v34, 0.0 }
 0x215   :  { %v2061_v17 = vmax.f32 %v1807_v9, 0.0  ;;  %2220 = vadd.xlane.f32.xlu1 %v2219_v33  ;;  %v3142_v35 = vpop.f32.mrb[50].mxu1  ;;  %v2222_v30 = vsel %vm1467_vm2, %v2130_v16, 0.0 }
 0x216   :  { %v1822_v37 = vadd.f32 %v3142_v35, %v4102_v4  ;;  %2223 = vadd.xlane.f32.xlu0 %v2222_v30  ;;  %v1816_v39 = vpop.f32.mrb[51].mxu1  ;;  %v2133_v42 = vmul.f32 %v4109_v25, %v2062_v29 }
 0x217   :  { %v1817_v32 = vadd.f32 %v4102_v4, %v1816_v39  ;;  %v2132_v40 = vmul.f32 %v4109_v25, %v2061_v17 }
 0x218   :  { %v2064_v18 = vmax.f32 %v1822_v37, 0.0  ;;  %v2231_v44 = vsel %vm1467_vm2, %v2133_v42, 0.0 }
 0x219   :  { %v2063_v36 = vmax.f32 %v1817_v32, 0.0  ;;  %2226 = vadd.xlane.f32.xlu1 %v2225_v41  ;;  %v3145_v19 = vpop.f32.mrb[52].mxu1  ;;  %v2228_v43 = vsel %vm1467_vm2, %v2132_v40, 0.0 }
 0x21a   :  { %v1832_v38 = vadd.f32 %v3145_v19, %v4102_v4  ;;  %2229 = vadd.xlane.f32.xlu0 %v2228_v43  ;;  %v1826_v45 = vpop.f32.mrb[53].mxu1  ;;  %v2135_v49 = vmul.f32 %v4109_v25, %v2064_v18 }
 0x21b   :  { %v1827_v47 = vadd.f32 %v4102_v4, %v1826_v45  ;;  %v2134_v48 = vmul.f32 %v4109_v25, %v2063_v36 }
 0x21c   :  { %v2066_v20 = vmax.f32 %v1832_v38, 0.0  ;;  %v2237_v22 = vsel %vm1467_vm2, %v2135_v49, 0.0 }
 0x21d   :  { %v2065_v50 = vmax.f32 %v1827_v47, 0.0  ;;  %2232 = vadd.xlane.f32.xlu1 %v2231_v44  ;;  %v3148_v46 = vpop.f32.mrb[54].mxu1  ;;  %v2234_v21 = vsel %vm1467_vm2, %v2134_v48, 0.0 }
 0x21e   :  { %v1842_v51 = vadd.f32 %v3148_v46, %v4102_v4  ;;  %2235 = vadd.xlane.f32.xlu0 %v2234_v21  ;;  %v1836_v10 = vpop.f32.mrb[55].mxu1  ;;  %v2137_v54 = vmul.f32 %v4109_v25, %v2066_v20 }
 0x21f   :  { %v1837_v11 = vadd.f32 %v4102_v4, %v1836_v10  ;;  %v2136_v52 = vmul.f32 %v4109_v25, %v2065_v50 }
 0x220   :  { %v2068_v53 = vmax.f32 %v1842_v51, 0.0  ;;  %v2243_v59 = vsel %vm1467_vm2, %v2137_v54, 0.0 }
 0x221   :  { %v2067_v55 = vmax.f32 %v1837_v11, 0.0  ;;  %2238 = vadd.xlane.f32.xlu1 %v2237_v22  ;;  %v3151_v56 = vpop.f32.mrb[56].mxu1  ;;  %v2240_v23 = vsel %vm1467_vm2, %v2136_v52, 0.0 }
 0x222   :  { %v1852_v57 = vadd.f32 %v3151_v56, %v4102_v4  ;;  %2241 = vadd.xlane.f32.xlu0 %v2240_v23  ;;  %v1846_v60 = vpop.f32.mrb[57].mxu1  ;;  %v2139_v24 = vmul.f32 %v4109_v25, %v2068_v53 }
 0x223   :  { %v1847_v58 = vadd.f32 %v4102_v4, %v1846_v60  ;;  %v2138_v12 = vmul.f32 %v4109_v25, %v2067_v55 }
 0x224   :  { %v2070_v62 = vmax.f32 %v1852_v57, 0.0  ;;  %v2249_v26 = vsel %vm1467_vm2, %v2139_v24, 0.0 }
 0x225   :  { %v2069_v6 = vmax.f32 %v1847_v58, 0.0  ;;  %2244 = vadd.xlane.f32.xlu1 %v2243_v59  ;;  %v3154_v13 = vpop.f32.mrb[58].mxu1  ;;  %v2246_v61 = vsel %vm1467_vm2, %v2138_v12, 0.0 }
 0x226   :  { %v1862_v31 = vadd.f32 %v3154_v13, %v4102_v4  ;;  %2247 = vadd.xlane.f32.xlu0 %v2246_v61  ;;  %v1856_v63 = vpop.f32.mrb[59].mxu1  ;;  %v2141_v2 = vmul.f32 %v4109_v25, %v2070_v62 }
 0x227   :  { %v1857_v0 = vadd.f32 %v4102_v4, %v1856_v63  ;;  %v2140_v1 = vmul.f32 %v4109_v25, %v2069_v6 }
 0x228   :  { %v2072_v14 = vmax.f32 %v1862_v31, 0.0  ;;  %v2255_v16 = vsel %vm1467_vm2, %v2141_v2, 0.0 }
 0x229   :  { %v2071_v3 = vmax.f32 %v1857_v0, 0.0  ;;  %2250 = vadd.xlane.f32.xlu1 %v2249_v26  ;;  %v3157_v27 = vpop.f32.mrb[60].mxu1  ;;  %v2252_v15 = vsel %vm1467_vm2, %v2140_v1, 0.0 }
 0x22a   :  { %v1872_v5 = vadd.f32 %v3157_v27, %v4102_v4  ;;  %2253 = vadd.xlane.f32.xlu0 %v2252_v15  ;;  %v1866_v7 = vpop.f32.mrb[61].mxu1  ;;  %v2143_v29 = vmul.f32 %v4109_v25, %v2072_v14 }
 0x22b   :  { %v1867_v8 = vadd.f32 %v4102_v4, %v1866_v7  ;;  %v2142_v28 = vmul.f32 %v4109_v25, %v2071_v3 }
 0x22c   :  { %v2074_v9 = vmax.f32 %v1872_v5, 0.0  ;;  %v2261_v40 = vsel %vm1467_vm2, %v2143_v29, 0.0 }
 0x22d   :  { %v2073_v33 = vmax.f32 %v1867_v8, 0.0  ;;  %2256 = vadd.xlane.f32.xlu1 %v2255_v16  ;;  %v3160_v34 = vpop.f32.mrb[62].mxu1  ;;  %v2258_v17 = vsel %vm1467_vm2, %v2142_v28, 0.0 }
 0x22e   :  { %v1882_v35 = vadd.f32 %v3160_v34, %v4102_v4  ;;  %2259 = vadd.xlane.f32.xlu0 %v2258_v17  ;;  %v1876_v30 = vpop.f32.mrb[63].mxu1  ;;  %v2145_v18 = vmul.f32 %v4109_v25, %v2074_v9 }
 0x22f   :  { %v1877_v37 = vadd.f32 %v4102_v4, %v1876_v30  ;;  %v2144_v39 = vmul.f32 %v4109_v25, %v2073_v33 }
 0x230   :  { %v2076_v32 = vmax.f32 %v1882_v35, 0.0  ;;  %v2267_v45 = vsel %vm1467_vm2, %v2145_v18, 0.0 }
 0x231   :  { %v2075_v41 = vmax.f32 %v1877_v37, 0.0  ;;  %2262 = vadd.xlane.f32.xlu1 %v2261_v40  ;;  %v2264_v42 = vsel %vm1467_vm2, %v2144_v39, 0.0 }
 0x232   :  { %2265 = vadd.xlane.f32.xlu0 %v2264_v42  ;;  %v2147_v47 = vmul.f32 %v4109_v25, %v2076_v32 }
 0x233   :  { %v3163_v36 = vpop.f32.mrb[64].mxu1  ;;  %v2146_v19 = vmul.f32 %v4109_v25, %v2075_v41 }
 0x234   :  { %v1892_v43 = vadd.f32 %v3163_v36, %v4102_v4  ;;  %v1886_v38 = vpop.f32.mrb[65].mxu1  ;;  %v2273_v51 = vsel %vm1467_vm2, %v2147_v47, 0.0 }
 0x235   :  { %v1887_v48 = vadd.f32 %v4102_v4, %v1886_v38  ;;  %2268 = vadd.xlane.f32.xlu1 %v2267_v45  ;;  %v2270_v20 = vsel %vm1467_vm2, %v2146_v19, 0.0 }
 0x236   :  { %v2078_v44 = vmax.f32 %v1892_v43, 0.0  ;;  %2271 = vadd.xlane.f32.xlu0 %v2270_v20 }
 0x237   :  { %v2077_v49 = vmax.f32 %v1887_v48, 0.0  ;;  %v3166_v50 = vpop.f32.mrb[66].mxu1 }
 0x238   :  { %v1902_v46 = vadd.f32 %v3166_v50, %v4102_v4  ;;  %v1896_v21 = vpop.f32.mrb[67].mxu1  ;;  %v2149_v10 = vmul.f32 %v4109_v25, %v2078_v44 }
 0x239   :  { %v1897_v11 = vadd.f32 %v4102_v4, %v1896_v21  ;;  %2274 = vadd.xlane.f32.xlu1 %v2273_v51  ;;  %v2148_v52 = vmul.f32 %v4109_v25, %v2077_v49 }
 0x23a   :  { %v2080_v53 = vmax.f32 %v1902_v46, 0.0  ;;  %v2279_v57 = vsel %vm1467_vm2, %v2149_v10, 0.0 }
 0x23b   :  { %v2079_v22 = vmax.f32 %v1897_v11, 0.0  ;;  %v3169_v54 = vpop.f32.mrb[68].mxu1  ;;  %v2276_v55 = vsel %vm1467_vm2, %v2148_v52, 0.0 }
 0x23c   :  { %v1912_v56 = vadd.f32 %v3169_v54, %v4102_v4  ;;  %v1906_v23 = vpop.f32.mrb[69].mxu1  ;;  %2277 = vadd.xlane.f32.xlu0 %v2276_v55  ;;  %v2151_v60 = vmul.f32 %v4109_v25, %v2080_v53 }
 0x23d   :  { %v1907_v58 = vadd.f32 %v4102_v4, %v1906_v23  ;;  %2280 = vadd.xlane.f32.xlu1 %v2279_v57  ;;  %v2150_v12 = vmul.f32 %v4109_v25, %v2079_v22 }
 0x23e   :  { %v2082_v62 = vmax.f32 %v1912_v56, 0.0  ;;  %v2285_v31 = vsel %vm1467_vm2, %v2151_v60, 0.0 }
 0x23f   :  { %v2081_v59 = vmax.f32 %v1907_v58, 0.0  ;;  %v3172_v24 = vpop.f32.mrb[70].mxu1  ;;  %v2282_v6 = vsel %vm1467_vm2, %v2150_v12, 0.0 }
 0x240   :  { %v1922_v13 = vadd.f32 %v3172_v24, %v4102_v4  ;;  %v1916_v61 = vpop.f32.mrb[71].mxu1  ;;  %2283 = vadd.xlane.f32.xlu0 %v2282_v6  ;;  %v2153_v63 = vmul.f32 %v4109_v25, %v2082_v62 }
 0x241   :  { %v1917_v0 = vadd.f32 %v4102_v4, %v1916_v61  ;;  %2286 = vadd.xlane.f32.xlu1 %v2285_v31  ;;  %v2152_v1 = vmul.f32 %v4109_v25, %v2081_v59 }
 0x242   :  { %v2084_v14 = vmax.f32 %v1922_v13, 0.0  ;;  %v2291_v5 = vsel %vm1467_vm2, %v2153_v63, 0.0 }
 0x243   :  { %v2083_v26 = vmax.f32 %v1917_v0, 0.0  ;;  %v3175_v2 = vpop.f32.mrb[72].mxu1  ;;  %v2288_v3 = vsel %vm1467_vm2, %v2152_v1, 0.0 }
 0x244   :  { %v1932_v27 = vadd.f32 %v3175_v2, %v4102_v4  ;;  %v1926_v15 = vpop.f32.mrb[73].mxu1  ;;  %2289 = vadd.xlane.f32.xlu0 %v2288_v3  ;;  %v2155_v7 = vmul.f32 %v4109_v25, %v2084_v14 }
 0x245   :  { %v1927_v8 = vadd.f32 %v4102_v4, %v1926_v15  ;;  %2292 = vadd.xlane.f32.xlu1 %v2291_v5  ;;  %v2154_v28 = vmul.f32 %v4109_v25, %v2083_v26 }
 0x246   :  { %v2086_v9 = vmax.f32 %v1932_v27, 0.0  ;;  %v2297_v35 = vsel %vm1467_vm2, %v2155_v7, 0.0 }
 0x247   :  { %v2085_v16 = vmax.f32 %v1927_v8, 0.0  ;;  %v3178_v29 = vpop.f32.mrb[74].mxu1  ;;  %v2294_v33 = vsel %vm1467_vm2, %v2154_v28, 0.0 }
 0x248   :  { %v1942_v34 = vadd.f32 %v3178_v29, %v4102_v4  ;;  %v1936_v17 = vpop.f32.mrb[75].mxu1  ;;  %2295 = vadd.xlane.f32.xlu0 %v2294_v33  ;;  %v2157_v30 = vmul.f32 %v4109_v25, %v2086_v9 }
 0x249   :  { %v1937_v37 = vadd.f32 %v4102_v4, %v1936_v17  ;;  %2298 = vadd.xlane.f32.xlu1 %v2297_v35  ;;  %v2156_v39 = vmul.f32 %v4109_v25, %v2085_v16 }
 0x24a   :  { %v2088_v32 = vmax.f32 %v1942_v34, 0.0  ;;  %v2303_v19 = vsel %vm1467_vm2, %v2157_v30, 0.0 }
 0x24b   :  { %v2087_v40 = vmax.f32 %v1937_v37, 0.0  ;;  %v3181_v18 = vpop.f32.mrb[76].mxu1  ;;  %v2300_v41 = vsel %vm1467_vm2, %v2156_v39, 0.0 }
 0x24c   :  { %v1952_v42 = vadd.f32 %v3181_v18, %v4102_v4  ;;  %v1946_v36 = vpop.f32.mrb[77].mxu1  ;;  %2301 = vadd.xlane.f32.xlu0 %v2300_v41  ;;  %v2159_v43 = vmul.f32 %v4109_v25, %v2088_v32 }
 0x24d   :  { %v1947_v38 = vadd.f32 %v4102_v4, %v1946_v36  ;;  %2304 = vadd.xlane.f32.xlu1 %v2303_v19  ;;  %v2158_v45 = vmul.f32 %v4109_v25, %v2087_v40 }
 0x24e   :  { %v2090_v47 = vmax.f32 %v1952_v42, 0.0  ;;  %v2309_v46 = vsel %vm1467_vm2, %v2159_v43, 0.0 }
 0x24f   :  { %v2089_v48 = vmax.f32 %v1947_v38, 0.0  ;;  %v3184_v20 = vpop.f32.mrb[78].mxu1  ;;  %v2306_v44 = vsel %vm1467_vm2, %v2158_v45, 0.0 }
 0x250   :  { %v1962_v49 = vadd.f32 %v3184_v20, %v4102_v4  ;;  %v1956_v50 = vpop.f32.mrb[79].mxu1  ;;  %2307 = vadd.xlane.f32.xlu0 %v2306_v44  ;;  %v2161_v21 = vmul.f32 %v4109_v25, %v2090_v47 }
 0x251   :  { %v1957_v51 = vadd.f32 %v4102_v4, %v1956_v50  ;;  %2310 = vadd.xlane.f32.xlu1 %v2309_v46  ;;  %v2160_v10 = vmul.f32 %v4109_v25, %v2089_v48 }
 0x252   :  { %v2092_v11 = vmax.f32 %v1962_v49, 0.0  ;;  %v2315_v56 = vsel %vm1467_vm2, %v2161_v21, 0.0 }
 0x253   :  { %v2091_v52 = vmax.f32 %v1957_v51, 0.0  ;;  %v3187_v53 = vpop.f32.mrb[80].mxu1  ;;  %v2312_v22 = vsel %vm1467_vm2, %v2160_v10, 0.0 }
 0x254   :  { %v1972_v54 = vadd.f32 %v3187_v53, %v4102_v4  ;;  %v1966_v55 = vpop.f32.mrb[81].mxu1  ;;  %2313 = vadd.xlane.f32.xlu0 %v2312_v22  ;;  %v2163_v23 = vmul.f32 %v4109_v25, %v2092_v11 }
 0x255   :  { %v1967_v57 = vadd.f32 %v4102_v4, %v1966_v55  ;;  %2316 = vadd.xlane.f32.xlu1 %v2315_v56  ;;  %v2162_v60 = vmul.f32 %v4109_v25, %v2091_v52 }
 0x256   :  { %v2094_v58 = vmax.f32 %v1972_v54, 0.0  ;;  %v2321_v13 = vsel %vm1467_vm2, %v2163_v23, 0.0 }
 0x257   :  { %v2093_v12 = vmax.f32 %v1967_v57, 0.0  ;;  %v3190_v62 = vpop.f32.mrb[82].mxu1  ;;  %v2318_v59 = vsel %vm1467_vm2, %v2162_v60, 0.0 }
 0x258   :  { %v1982_v24 = vadd.f32 %v3190_v62, %v4102_v4  ;;  %v1976_v6 = vpop.f32.mrb[83].mxu1  ;;  %2319 = vadd.xlane.f32.xlu0 %v2318_v59  ;;  %v2165_v61 = vmul.f32 %v4109_v25, %v2094_v58 }
 0x259   :  { %v1977_v31 = vadd.f32 %v4102_v4, %v1976_v6  ;;  %2322 = vadd.xlane.f32.xlu1 %v2321_v13  ;;  %v2164_v63 = vmul.f32 %v4109_v25, %v2093_v12 }
 0x25a   :  { %v2096_v0 = vmax.f32 %v1982_v24, 0.0  ;;  %v2327_v27 = vsel %vm1467_vm2, %v2165_v61, 0.0 }
 0x25b   :  { %v2095_v1 = vmax.f32 %v1977_v31, 0.0  ;;  %v3193_v14 = vpop.f32.mrb[84].mxu1  ;;  %v2324_v26 = vsel %vm1467_vm2, %v2164_v63, 0.0 }
 0x25c   :  { %v1992_v2 = vadd.f32 %v3193_v14, %v4102_v4  ;;  %v1986_v3 = vpop.f32.mrb[85].mxu1  ;;  %2325 = vadd.xlane.f32.xlu0 %v2324_v26  ;;  %v2167_v15 = vmul.f32 %v4109_v25, %v2096_v0 }
 0x25d   :  { %v1987_v5 = vadd.f32 %v4102_v4, %v1986_v3  ;;  %2328 = vadd.xlane.f32.xlu1 %v2327_v27  ;;  %v2166_v7 = vmul.f32 %v4109_v25, %v2095_v1  ;;  %v4304_v3 = vld [vmem:[#allocation2] ss:$0 sm:$0xff] }
 0x25e   :  { %v2098_v8 = vmax.f32 %v1992_v2, 0.0  ;;  %v2333_v34 = vsel %vm1467_vm2, %v2167_v15, 0.0 }
 0x25f   :  { %v2097_v28 = vmax.f32 %v1987_v5, 0.0  ;;  %v3196_v9 = vpop.f32.mrb[86].mxu1  ;;  %v2330_v16 = vsel %vm1467_vm2, %v2166_v7, 0.0 }
 0x260   :  { %v2002_v29 = vadd.f32 %v3196_v9, %v4102_v4  ;;  %v1996_v33 = vpop.f32.mrb[87].mxu1  ;;  %2331 = vadd.xlane.f32.xlu0 %v2330_v16  ;;  %v2169_v17 = vmul.f32 %v4109_v25, %v2098_v8 }
 0x261   :  { %v1997_v35 = vadd.f32 %v4102_v4, %v1996_v33  ;;  %2334 = vadd.xlane.f32.xlu1 %v2333_v34  ;;  %v2168_v30 = vmul.f32 %v4109_v25, %v2097_v28 }
 0x262   :  { %v2100_v37 = vmax.f32 %v2002_v29, 0.0  ;;  %v2339_v42 = vsel %vm1467_vm2, %v2169_v17, 0.0 }
 0x263   :  { %v2099_v39 = vmax.f32 %v1997_v35, 0.0  ;;  %v3199_v32 = vpop.f32.mrb[88].mxu1  ;;  %v2336_v40 = vsel %vm1467_vm2, %v2168_v30, 0.0 }
 0x264   :  { %v2012_v18 = vadd.f32 %v3199_v32, %v4102_v4  ;;  %v2006_v41 = vpop.f32.mrb[89].mxu1  ;;  %2337 = vadd.xlane.f32.xlu0 %v2336_v40  ;;  %v2171_v36 = vmul.f32 %v4109_v25, %v2100_v37 }
 0x265   :  { %v2007_v19 = vadd.f32 %v4102_v4, %v2006_v41  ;;  %2340 = vadd.xlane.f32.xlu1 %v2339_v42  ;;  %v2170_v43 = vmul.f32 %v4109_v25, %v2099_v39 }
 0x266   :  { %v2102_v38 = vmax.f32 %v2012_v18, 0.0  ;;  %v2345_v49 = vsel %vm1467_vm2, %v2171_v36, 0.0 }
 0x267   :  { %v2101_v45 = vmax.f32 %v2007_v19, 0.0  ;;  %v3202_v47 = vpop.f32.mrb[90].mxu1  ;;  %v2342_v48 = vsel %vm1467_vm2, %v2170_v43, 0.0 }
 0x268   :  { %v2022_v20 = vadd.f32 %v3202_v47, %v4102_v4  ;;  %v2016_v44 = vpop.f32.mrb[91].mxu1  ;;  %2343 = vadd.xlane.f32.xlu0 %v2342_v48  ;;  %v2173_v50 = vmul.f32 %v4109_v25, %v2102_v38 }
 0x269   :  { %v2017_v46 = vadd.f32 %v4102_v4, %v2016_v44  ;;  %2346 = vadd.xlane.f32.xlu1 %v2345_v49  ;;  %v2172_v21 = vmul.f32 %v4109_v25, %v2101_v45 }
 0x26a   :  { %v2104_v51 = vmax.f32 %v2022_v20, 0.0  ;;  %v2351_v54 = vsel %vm1467_vm2, %v2173_v50, 0.0 }
 0x26b   :  { %v2103_v10 = vmax.f32 %v2017_v46, 0.0  ;;  %v3205_v11 = vpop.f32.mrb[92].mxu1  ;;  %v2348_v52 = vsel %vm1467_vm2, %v2172_v21, 0.0 }
 0x26c   :  { %v2032_v53 = vadd.f32 %v3205_v11, %v4102_v4  ;;  %v2026_v22 = vpop.f32.mrb[93].mxu1  ;;  %2349 = vadd.xlane.f32.xlu0 %v2348_v52  ;;  %v2175_v55 = vmul.f32 %v4109_v25, %v2104_v51 }
 0x26d   :  { %v2027_v56 = vadd.f32 %v4102_v4, %v2026_v22  ;;  %2352 = vadd.xlane.f32.xlu1 %v2351_v54  ;;  %v2174_v23 = vmul.f32 %v4109_v25, %v2103_v10 }
 0x26e   :  { %v2106_v57 = vmax.f32 %v2032_v53, 0.0  ;;  %v2357_v24 = vsel %vm1467_vm2, %v2175_v55, 0.0 }
 0x26f   :  { %v2105_v60 = vmax.f32 %v2027_v56, 0.0  ;;  %v3208_v58 = vpop.f32.mrb[94].mxu1  ;;  %v2354_v12 = vsel %vm1467_vm2, %v2174_v23, 0.0 }
 0x270   :  { %v2042_v62 = vadd.f32 %v3208_v58, %v4102_v4  ;;  %v2036_v59 = vpop.f32.mrb[95].mxu1  ;;  %2355 = vadd.xlane.f32.xlu0 %v2354_v12  ;;  %v2177_v6 = vmul.f32 %v4109_v25, %v2106_v57 }
 0x271   :  { %v2037_v13 = vadd.f32 %v4102_v4, %v2036_v59  ;;  %2358 = vadd.xlane.f32.xlu1 %v2357_v24  ;;  %v2176_v61 = vmul.f32 %v4109_v25, %v2105_v60 }
 0x272   :  { %v2108_v31 = vmax.f32 %v2042_v62, 0.0  ;;  %v2363_v1 = vsel %vm1467_vm2, %v2177_v6, 0.0 }
 0x273   :  { %v2107_v63 = vmax.f32 %v2037_v13, 0.0  ;;  %v2360_v0 = vsel %vm1467_vm2, %v2176_v61, 0.0 }
 0x274   :  { %2361 = vadd.xlane.f32.xlu0 %v2360_v0  ;;  %v2179_v14 = vmul.f32 %v4109_v25, %v2108_v31 }
 0x275   :  { %2364 = vadd.xlane.f32.xlu1 %v2363_v1  ;;  %v2178_v26 = vmul.f32 %v4109_v25, %v2107_v63 }
 0x276   :  { %v2369_v4 = vsel %vm1467_vm2, %v2179_v14, 0.0 }
 0x277   :  { %v2366_v2 = vsel %vm1467_vm2, %v2178_v26, 0.0 }
 0x278   :  { %2367 = vadd.xlane.f32.xlu0 %v2366_v2 }
 0x279   :  { %2370 = vadd.xlane.f32.xlu1 %v2369_v4 }
 0x286   :  { %v2185_v27 = vpop.xlane.xlu0 %2184 }
 0x287   :  { %v2380_v15 = vadd.f32 %v4304_v3, %v2185_v27 }
 0x289   :  { %2445 = vst.msk [vmem:[%s4635_s9 + $0x8] sm:$0xff] %vm2443_vm3, %v2380_v15 }
 0x28a   :  { %v2182_v5 = vpop.xlane.xlu0 %2181  ;;  %v2191_v7 = vpop.xlane.xlu1 %2190 }
 0x28b   :  { %v2379_v25 = vadd.f32 %v4304_v3, %v2182_v5  ;;  %v2382_v8 = vadd.f32 %v4304_v3, %v2191_v7 }
 0x28d   :  { %2444 = vst.msk [vmem:[%s4635_s9] sm:$0xff] %vm2443_vm3, %v2379_v25  ;;  %2447 = vst.msk [vmem:[%s4635_s9 + $0x18] sm:$0xff] %vm2443_vm3, %v2382_v8 }
 0x28e   :  { %v2188_v28 = vpop.xlane.xlu1 %2187 }
 0x28f   :  { %v2381_v9 = vadd.f32 %v4304_v3, %v2188_v28  ;;  %v2194_v16 = vpop.xlane.xlu0 %2193 }
 0x290   :  { %v2383_v29 = vadd.f32 %v4304_v3, %v2194_v16 }
 0x291   :  { %2446 = vst.msk [vmem:[%s4635_s9 + $0x10] sm:$0xff] %vm2443_vm3, %v2381_v9 }
 0x292   :  { %2448 = vst.msk [vmem:[%s4635_s9 + $0x20] sm:$0xff] %vm2443_vm3, %v2383_v29  ;;  %v2197_v33 = vpop.xlane.xlu1 %2196 }
 0x293   :  { %v2384_v34 = vadd.f32 %v4304_v3, %v2197_v33  ;;  %v2200_v17 = vpop.xlane.xlu0 %2199 }
 0x294   :  { %v2385_v35 = vadd.f32 %v4304_v3, %v2200_v17 }
 0x295   :  { %2449 = vst.msk [vmem:[%s4635_s9 + $0x28] sm:$0xff] %vm2443_vm3, %v2384_v34 }
 0x296   :  { %2450 = vst.msk [vmem:[%s4635_s9 + $0x30] sm:$0xff] %vm2443_vm3, %v2385_v35  ;;  %v2203_v30 = vpop.xlane.xlu1 %2202 }
 0x297   :  { %v2386_v37 = vadd.f32 %v4304_v3, %v2203_v30  ;;  %v2206_v39 = vpop.xlane.xlu0 %2205 }
 0x298   :  { %v2387_v32 = vadd.f32 %v4304_v3, %v2206_v39 }
 0x299   :  { %2451 = vst.msk [vmem:[%s4635_s9 + $0x38] sm:$0xff] %vm2443_vm3, %v2386_v37 }
 0x29a   :  { %2452 = vst.msk [vmem:[%s4635_s9 + $0x40] sm:$0xff] %vm2443_vm3, %v2387_v32  ;;  %v2209_v40 = vpop.xlane.xlu1 %2208 }
 0x29b   :  { %v2388_v18 = vadd.f32 %v4304_v3, %v2209_v40  ;;  %v2212_v41 = vpop.xlane.xlu0 %2211 }
 0x29c   :  { %v2389_v42 = vadd.f32 %v4304_v3, %v2212_v41 }
 0x29d   :  { %2453 = vst.msk [vmem:[%s4635_s9 + $0x48] sm:$0xff] %vm2443_vm3, %v2388_v18 }
 0x29e   :  { %2454 = vst.msk [vmem:[%s4635_s9 + $0x50] sm:$0xff] %vm2443_vm3, %v2389_v42  ;;  %v2215_v36 = vpop.xlane.xlu1 %2214 }
 0x29f   :  { %v2390_v19 = vadd.f32 %v4304_v3, %v2215_v36  ;;  %v2218_v43 = vpop.xlane.xlu0 %2217 }
 0x2a0   :  { %v2391_v38 = vadd.f32 %v4304_v3, %v2218_v43 }
 0x2a1   :  { %2455 = vst.msk [vmem:[%s4635_s9 + $0x58] sm:$0xff] %vm2443_vm3, %v2390_v19 }
 0x2a2   :  { %2456 = vst.msk [vmem:[%s4635_s9 + $0x60] sm:$0xff] %vm2443_vm3, %v2391_v38  ;;  %v2221_v45 = vpop.xlane.xlu1 %2220 }
 0x2a3   :  { %v2392_v47 = vadd.f32 %v4304_v3, %v2221_v45  ;;  %v2224_v48 = vpop.xlane.xlu0 %2223 }
 0x2a4   :  { %v2393_v20 = vadd.f32 %v4304_v3, %v2224_v48 }
 0x2a5   :  { %2457 = vst.msk [vmem:[%s4635_s9 + $0x68] sm:$0xff] %vm2443_vm3, %v2392_v47 }
 0x2a6   :  { %2458 = vst.msk [vmem:[%s4635_s9 + $0x70] sm:$0xff] %vm2443_vm3, %v2393_v20  ;;  %v2227_v44 = vpop.xlane.xlu1 %2226 }
 0x2a7   :  { %v2394_v49 = vadd.f32 %v4304_v3, %v2227_v44  ;;  %v2230_v50 = vpop.xlane.xlu0 %2229 }
 0x2a8   :  { %v2395_v46 = vadd.f32 %v4304_v3, %v2230_v50 }
 0x2a9   :  { %2459 = vst.msk [vmem:[%s4635_s9 + $0x78] sm:$0xff] %vm2443_vm3, %v2394_v49 }
 0x2aa   :  { %2460 = vst.msk [vmem:[%s4635_s9 + $0x80] sm:$0xff] %vm2443_vm3, %v2395_v46  ;;  %v2233_v21 = vpop.xlane.xlu1 %2232 }
 0x2ab   :  { %v2396_v51 = vadd.f32 %v4304_v3, %v2233_v21  ;;  %v2236_v10 = vpop.xlane.xlu0 %2235 }
 0x2ac   :  { %v2397_v11 = vadd.f32 %v4304_v3, %v2236_v10 }
 0x2ad   :  { %2461 = vst.msk [vmem:[%s4635_s9 + $0x88] sm:$0xff] %vm2443_vm3, %v2396_v51 }
 0x2ae   :  { %2462 = vst.msk [vmem:[%s4635_s9 + $0x90] sm:$0xff] %vm2443_vm3, %v2397_v11  ;;  %v2239_v52 = vpop.xlane.xlu1 %2238 }
 0x2af   :  { %v2398_v53 = vadd.f32 %v4304_v3, %v2239_v52  ;;  %v2242_v22 = vpop.xlane.xlu0 %2241 }
 0x2b0   :  { %v2399_v54 = vadd.f32 %v4304_v3, %v2242_v22 }
 0x2b1   :  { %2463 = vst.msk [vmem:[%s4635_s9 + $0x98] sm:$0xff] %vm2443_vm3, %v2398_v53 }
 0x2b2   :  { %2464 = vst.msk [vmem:[%s4635_s9 + $0xa0] sm:$0xff] %vm2443_vm3, %v2399_v54  ;;  %v2245_v55 = vpop.xlane.xlu1 %2244 }
 0x2b3   :  { %v2400_v56 = vadd.f32 %v4304_v3, %v2245_v55  ;;  %v2248_v23 = vpop.xlane.xlu0 %2247 }
 0x2b4   :  { %v2401_v57 = vadd.f32 %v4304_v3, %v2248_v23 }
 0x2b5   :  { %2465 = vst.msk [vmem:[%s4635_s9 + $0xa8] sm:$0xff] %vm2443_vm3, %v2400_v56 }
 0x2b6   :  { %2466 = vst.msk [vmem:[%s4635_s9 + $0xb0] sm:$0xff] %vm2443_vm3, %v2401_v57  ;;  %v2251_v60 = vpop.xlane.xlu1 %2250 }
 0x2b7   :  { %v2402_v58 = vadd.f32 %v4304_v3, %v2251_v60  ;;  %v2254_v12 = vpop.xlane.xlu0 %2253 }
 0x2b8   :  { %v2403_v62 = vadd.f32 %v4304_v3, %v2254_v12 }
 0x2b9   :  { %2467 = vst.msk [vmem:[%s4635_s9 + $0xb8] sm:$0xff] %vm2443_vm3, %v2402_v58 }
 0x2ba   :  { %2468 = vst.msk [vmem:[%s4635_s9 + $0xc0] sm:$0xff] %vm2443_vm3, %v2403_v62  ;;  %v2257_v59 = vpop.xlane.xlu1 %2256 }
 0x2bb   :  { %v2404_v24 = vadd.f32 %v4304_v3, %v2257_v59  ;;  %v2260_v6 = vpop.xlane.xlu0 %2259 }
 0x2bc   :  { %v2405_v13 = vadd.f32 %v4304_v3, %v2260_v6 }
 0x2bd   :  { %2469 = vst.msk [vmem:[%s4635_s9 + $0xc8] sm:$0xff] %vm2443_vm3, %v2404_v24 }
 0x2be   :  { %2470 = vst.msk [vmem:[%s4635_s9 + $0xd0] sm:$0xff] %vm2443_vm3, %v2405_v13  ;;  %v2263_v61 = vpop.xlane.xlu1 %2262 }
 0x2bf   :  { %v2406_v31 = vadd.f32 %v4304_v3, %v2263_v61  ;;  %v2266_v63 = vpop.xlane.xlu0 %2265 }
 0x2c0   :  { %v2407_v0 = vadd.f32 %v4304_v3, %v2266_v63 }
 0x2c1   :  { %2471 = vst.msk [vmem:[%s4635_s9 + $0xd8] sm:$0xff] %vm2443_vm3, %v2406_v31 }
 0x2c2   :  { %2472 = vst.msk [vmem:[%s4635_s9 + $0xe0] sm:$0xff] %vm2443_vm3, %v2407_v0  ;;  %v2269_v1 = vpop.xlane.xlu1 %2268 }
 0x2c3   :  { %v2408_v14 = vadd.f32 %v4304_v3, %v2269_v1  ;;  %v2272_v26 = vpop.xlane.xlu0 %2271 }
 0x2c4   :  { %v2409_v2 = vadd.f32 %v4304_v3, %v2272_v26 }
 0x2c5   :  { %2473 = vst.msk [vmem:[%s4635_s9 + $0xe8] sm:$0xff] %vm2443_vm3, %v2408_v14 }
 0x2c6   :  { %2474 = vst.msk [vmem:[%s4635_s9 + $0xf0] sm:$0xff] %vm2443_vm3, %v2409_v2  ;;  %v2275_v4 = vpop.xlane.xlu1 %2274 }
 0x2c7   :  { %v2410_v27 = vadd.f32 %v4304_v3, %v2275_v4 }
 0x2c9   :  { %2475 = vst.msk [vmem:[%s4635_s9 + $0xf8] sm:$0xff] %vm2443_vm3, %v2410_v27  ;;  %v2278_v15 = vpop.xlane.xlu0 %2277 }
 0x2ca   :  { %v2411_v5 = vadd.f32 %v4304_v3, %v2278_v15  ;;  %v2281_v7 = vpop.xlane.xlu1 %2280 }
 0x2cb   :  { %v2412_v25 = vadd.f32 %v4304_v3, %v2281_v7 }
 0x2cc   :  { %2476 = vst.msk [vmem:[%s4635_s9 + $0x100] sm:$0xff] %vm2443_vm3, %v2411_v5 }
 0x2cd   :  { %2477 = vst.msk [vmem:[%s4635_s9 + $0x108] sm:$0xff] %vm2443_vm3, %v2412_v25  ;;  %v2284_v8 = vpop.xlane.xlu0 %2283 }
 0x2ce   :  { %v2413_v28 = vadd.f32 %v4304_v3, %v2284_v8  ;;  %v2287_v9 = vpop.xlane.xlu1 %2286 }
 0x2cf   :  { %v2414_v16 = vadd.f32 %v4304_v3, %v2287_v9 }
 0x2d0   :  { %2478 = vst.msk [vmem:[%s4635_s9 + $0x110] sm:$0xff] %vm2443_vm3, %v2413_v28 }
 0x2d1   :  { %2479 = vst.msk [vmem:[%s4635_s9 + $0x118] sm:$0xff] %vm2443_vm3, %v2414_v16  ;;  %v2290_v29 = vpop.xlane.xlu0 %2289 }
 0x2d2   :  { %v2415_v33 = vadd.f32 %v4304_v3, %v2290_v29  ;;  %v2293_v34 = vpop.xlane.xlu1 %2292 }
 0x2d3   :  { %v2416_v17 = vadd.f32 %v4304_v3, %v2293_v34 }
 0x2d4   :  { %2480 = vst.msk [vmem:[%s4635_s9 + $0x120] sm:$0xff] %vm2443_vm3, %v2415_v33 }
 0x2d5   :  { %2481 = vst.msk [vmem:[%s4635_s9 + $0x128] sm:$0xff] %vm2443_vm3, %v2416_v17  ;;  %v2296_v35 = vpop.xlane.xlu0 %2295 }
 0x2d6   :  { %v2417_v30 = vadd.f32 %v4304_v3, %v2296_v35  ;;  %v2299_v37 = vpop.xlane.xlu1 %2298 }
 0x2d7   :  { %v2418_v39 = vadd.f32 %v4304_v3, %v2299_v37 }
 0x2d8   :  { %2482 = vst.msk [vmem:[%s4635_s9 + $0x130] sm:$0xff] %vm2443_vm3, %v2417_v30 }
 0x2d9   :  { %2483 = vst.msk [vmem:[%s4635_s9 + $0x138] sm:$0xff] %vm2443_vm3, %v2418_v39  ;;  %v2302_v32 = vpop.xlane.xlu0 %2301 }
 0x2da   :  { %v2419_v40 = vadd.f32 %v4304_v3, %v2302_v32  ;;  %v2305_v18 = vpop.xlane.xlu1 %2304 }
 0x2db   :  { %v2420_v41 = vadd.f32 %v4304_v3, %v2305_v18 }
 0x2dc   :  { %2484 = vst.msk [vmem:[%s4635_s9 + $0x140] sm:$0xff] %vm2443_vm3, %v2419_v40 }
 0x2dd   :  { %2485 = vst.msk [vmem:[%s4635_s9 + $0x148] sm:$0xff] %vm2443_vm3, %v2420_v41  ;;  %v2308_v42 = vpop.xlane.xlu0 %2307 }
 0x2de   :  { %v2421_v36 = vadd.f32 %v4304_v3, %v2308_v42  ;;  %v2311_v19 = vpop.xlane.xlu1 %2310 }
 0x2df   :  { %v2422_v43 = vadd.f32 %v4304_v3, %v2311_v19 }
 0x2e0   :  { %2486 = vst.msk [vmem:[%s4635_s9 + $0x150] sm:$0xff] %vm2443_vm3, %v2421_v36 }
 0x2e1   :  { %2487 = vst.msk [vmem:[%s4635_s9 + $0x158] sm:$0xff] %vm2443_vm3, %v2422_v43  ;;  %v2314_v38 = vpop.xlane.xlu0 %2313 }
 0x2e2   :  { %v2423_v45 = vadd.f32 %v4304_v3, %v2314_v38  ;;  %v2317_v47 = vpop.xlane.xlu1 %2316 }
 0x2e3   :  { %v2424_v48 = vadd.f32 %v4304_v3, %v2317_v47 }
 0x2e4   :  { %2488 = vst.msk [vmem:[%s4635_s9 + $0x160] sm:$0xff] %vm2443_vm3, %v2423_v45 }
 0x2e5   :  { %2489 = vst.msk [vmem:[%s4635_s9 + $0x168] sm:$0xff] %vm2443_vm3, %v2424_v48  ;;  %v2320_v20 = vpop.xlane.xlu0 %2319 }
 0x2e6   :  { %v2425_v44 = vadd.f32 %v4304_v3, %v2320_v20  ;;  %v2323_v49 = vpop.xlane.xlu1 %2322 }
 0x2e7   :  { %v2426_v50 = vadd.f32 %v4304_v3, %v2323_v49 }
 0x2e8   :  { %2490 = vst.msk [vmem:[%s4635_s9 + $0x170] sm:$0xff] %vm2443_vm3, %v2425_v44 }
 0x2e9   :  { %2491 = vst.msk [vmem:[%s4635_s9 + $0x178] sm:$0xff] %vm2443_vm3, %v2426_v50  ;;  %v2326_v46 = vpop.xlane.xlu0 %2325 }
 0x2ea   :  { %v2427_v21 = vadd.f32 %v4304_v3, %v2326_v46  ;;  %v2329_v51 = vpop.xlane.xlu1 %2328 }
 0x2eb   :  { %v2428_v10 = vadd.f32 %v4304_v3, %v2329_v51 }
 0x2ec   :  { %2492 = vst.msk [vmem:[%s4635_s9 + $0x180] sm:$0xff] %vm2443_vm3, %v2427_v21 }
 0x2ed   :  { %2493 = vst.msk [vmem:[%s4635_s9 + $0x188] sm:$0xff] %vm2443_vm3, %v2428_v10  ;;  %v2332_v11 = vpop.xlane.xlu0 %2331 }
 0x2ee   :  { %v2429_v52 = vadd.f32 %v4304_v3, %v2332_v11  ;;  %v2335_v53 = vpop.xlane.xlu1 %2334 }
 0x2ef   :  { %v2430_v22 = vadd.f32 %v4304_v3, %v2335_v53 }
 0x2f0   :  { %2494 = vst.msk [vmem:[%s4635_s9 + $0x190] sm:$0xff] %vm2443_vm3, %v2429_v52 }
 0x2f1   :  { %2495 = vst.msk [vmem:[%s4635_s9 + $0x198] sm:$0xff] %vm2443_vm3, %v2430_v22  ;;  %v2338_v54 = vpop.xlane.xlu0 %2337 }
 0x2f2   :  { %v2431_v55 = vadd.f32 %v4304_v3, %v2338_v54  ;;  %v2341_v56 = vpop.xlane.xlu1 %2340 }
 0x2f3   :  { %v2432_v23 = vadd.f32 %v4304_v3, %v2341_v56 }
 0x2f4   :  { %2496 = vst.msk [vmem:[%s4635_s9 + $0x1a0] sm:$0xff] %vm2443_vm3, %v2431_v55 }
 0x2f5   :  { %2497 = vst.msk [vmem:[%s4635_s9 + $0x1a8] sm:$0xff] %vm2443_vm3, %v2432_v23  ;;  %v2344_v57 = vpop.xlane.xlu0 %2343 }
 0x2f6   :  { %v2433_v60 = vadd.f32 %v4304_v3, %v2344_v57  ;;  %v2347_v58 = vpop.xlane.xlu1 %2346 }
 0x2f7   :  { %v2434_v12 = vadd.f32 %v4304_v3, %v2347_v58 }
 0x2f8   :  { %2498 = vst.msk [vmem:[%s4635_s9 + $0x1b0] sm:$0xff] %vm2443_vm3, %v2433_v60 }
 0x2f9   :  { %2499 = vst.msk [vmem:[%s4635_s9 + $0x1b8] sm:$0xff] %vm2443_vm3, %v2434_v12  ;;  %v2350_v62 = vpop.xlane.xlu0 %2349 }
 0x2fa   :  { %v2435_v59 = vadd.f32 %v4304_v3, %v2350_v62  ;;  %v2353_v24 = vpop.xlane.xlu1 %2352 }
 0x2fb   :  { %v2436_v6 = vadd.f32 %v4304_v3, %v2353_v24 }
 0x2fc   :  { %2500 = vst.msk [vmem:[%s4635_s9 + $0x1c0] sm:$0xff] %vm2443_vm3, %v2435_v59 }
 0x2fd   :  { %2501 = vst.msk [vmem:[%s4635_s9 + $0x1c8] sm:$0xff] %vm2443_vm3, %v2436_v6  ;;  %v2356_v13 = vpop.xlane.xlu0 %2355 }
 0x2fe   :  { %v2437_v61 = vadd.f32 %v4304_v3, %v2356_v13  ;;  %v2359_v31 = vpop.xlane.xlu1 %2358 }
 0x2ff   :  { %v2438_v63 = vadd.f32 %v4304_v3, %v2359_v31 }
 0x300   :  { %2502 = vst.msk [vmem:[%s4635_s9 + $0x1d0] sm:$0xff] %vm2443_vm3, %v2437_v61 }
 0x301   :  { %2503 = vst.msk [vmem:[%s4635_s9 + $0x1d8] sm:$0xff] %vm2443_vm3, %v2438_v63  ;;  %v2362_v0 = vpop.xlane.xlu0 %2361 }
 0x302   :  { %v2439_v1 = vadd.f32 %v4304_v3, %v2362_v0  ;;  %v2365_v14 = vpop.xlane.xlu1 %2364 }
 0x303   :  { %v2440_v26 = vadd.f32 %v4304_v3, %v2365_v14 }
 0x304   :  { %2504 = vst.msk [vmem:[%s4635_s9 + $0x1e0] sm:$0xff] %vm2443_vm3, %v2439_v1 }
 0x305   :  { %2505 = vst.msk [vmem:[%s4635_s9 + $0x1e8] sm:$0xff] %vm2443_vm3, %v2440_v26  ;;  %v2368_v2 = vpop.xlane.xlu0 %2367 }
 0x306   :  { %v2441_v4 = vadd.f32 %v4304_v3, %v2368_v2  ;;  %v2371_v27 = vpop.xlane.xlu1 %2370 }
 0x307   :  { %v2442_v15 = vadd.f32 %v4304_v3, %v2371_v27 }
 0x308   :  { %2506 = vst.msk [vmem:[%s4635_s9 + $0x1f0] sm:$0xff] %vm2443_vm3, %v2441_v4 }
 0x309   :  { %2507 = vst.msk [vmem:[%s4635_s9 + $0x1f8] sm:$0xff] %vm2443_vm3, %v2442_v15 }

</bundles_post_ra>
